<compile_context>
chip_gen: v7x
topology: tpu7x:2x2x1
jax: 0.10.0
libtpu: 0.0.40
codegen_flags: <defaults>
</compile_context>

<pallas_src>
import functools
import math

import jax
import jax.numpy as jnp
from jax import lax
from jax.experimental import pallas as pl
from jax.experimental.pallas import tpu as pltpu

EPS = 1e-5              # nn.BatchNorm2d default eps
KH1, KW1 = 20, 40       # first-layer kernel
K1 = KH1 * KW1          # 800
K1P = 896               # K1 rounded up to a multiple of 128
CPAD = 128              # merged channel count (30 + 70 = 100) padded to 128 lanes


def _round_up(a, m):
    return (a + m - 1) // m * m


# ----------------------------------------------------------------------------
# Fused whole-network kernel (one grid step == one image)
# ----------------------------------------------------------------------------
def _tcrnet_kernel(x1_ref, w1_ref, b1_ref, w2_ref, b2_ref, w3_ref, b3_ref,
                   w4_ref, b4_ref, o_ref, a1_ref, a2_ref, *, wo1, r2, r3p):
    f32 = jnp.float32
    bf16 = jnp.bfloat16

    # Layer 1: merged [clt|tgt] 20x40 conv as one bf16 GEMM + folded BN + LeakyReLU(0.1).
    a1 = jnp.dot(x1_ref[...], w1_ref[...], preferred_element_type=f32)
    a1 = a1 + b1_ref[...]
    a1_ref[...] = jnp.where(a1 >= 0.0, a1, 0.1 * a1)

    # Layer 2: merged 3x3 conv = 9 shifted-row matmuls on the VMEM-resident
    # activation (block-diagonal weights keep the two streams independent).
    acc = jnp.zeros((r2, CPAD), f32)
    for dh in range(3):
        for dw in range(3):
            t = dh * wo1 + dw
            lhs = a1_ref[t:t + r2, :].astype(bf16)
            acc = acc + jnp.dot(lhs, w2_ref[dh * 3 + dw],
                                preferred_element_type=f32)
    acc = acc + b2_ref[...]
    a2_ref[...] = jnp.where(acc >= 0.0, acc, 0.1 * acc)

    # Layer 3: merged 3x3 conv + folded post-concat BN(100) + LeakyReLU(0.01).
    acc = jnp.zeros((r3p, CPAD), f32)
    for dh in range(3):
        for dw in range(3):
            t = dh * wo1 + dw
            lhs = a2_ref[t:t + r3p, :].astype(bf16)
            acc = acc + jnp.dot(lhs, w3_ref[dh * 3 + dw],
                                preferred_element_type=f32)
    acc = acc + b3_ref[...]
    a3 = jnp.where(acc >= 0.0, acc, 0.01 * acc)

    # Layer 4: cnv4 (1x1 conv), no activation -> skip the LeakyReLU select.
    o_ref[...] = jnp.dot(a3.astype(bf16), w4_ref[...],
                         preferred_element_type=f32) + b4_ref[...]


# ----------------------------------------------------------------------------
# Parameter folding (conv bias + inference BN into weights / bias; stream merge)
# ----------------------------------------------------------------------------
def _bn_fold(bn):
    g, b, m, v = bn
    s = g / jnp.sqrt(v + EPS)
    return s, b - m * s


def fold_params(p):
    f32 = jnp.float32

    # Layer 1 (channels [0:30]=clt, [30:100]=tgt), K ordered (kh, kw) since Cin=1.
    sc1, tc1 = _bn_fold(p["clt_bn1"])
    st1, tt1 = _bn_fold(p["tgt_bn1"])
    w_clt = jnp.transpose(p["cnv_clt_w"], (2, 3, 1, 0)).reshape(K1, 30)
    w_tgt = jnp.transpose(p["cnv_tgt_w"], (2, 3, 1, 0)).reshape(K1, 70)
    w1 = jnp.zeros((K1P, CPAD), f32)
    w1 = w1.at[:K1, 0:30].set(w_clt * sc1[None, :])
    w1 = w1.at[:K1, 30:100].set(w_tgt * st1[None, :])
    b1 = jnp.zeros((1, CPAD), f32)
    b1 = b1.at[0, 0:30].set(p["cnv_clt_b"] * sc1 + tc1)
    b1 = b1.at[0, 30:100].set(p["cnv_tgt_b"] * st1 + tt1)

    # Layer 2: block diag  clt(30)->clt2(50) , tgt(70)->tgt2(50); 9 taps (dh,dw).
    sc2, tc2 = _bn_fold(p["clt_bn2"])
    st2, tt2 = _bn_fold(p["tgt_bn2"])
    wc2 = jnp.transpose(p["cnv_clt2_w"], (2, 3, 1, 0)).reshape(9, 30, 50)
    wt2 = jnp.transpose(p["cnv_tgt2_w"], (2, 3, 1, 0)).reshape(9, 70, 50)
    w2 = jnp.zeros((9, CPAD, CPAD), f32)
    w2 = w2.at[:, 0:30, 0:50].set(wc2 * sc2[None, None, :])
    w2 = w2.at[:, 30:100, 50:100].set(wt2 * st2[None, None, :])
    b2 = jnp.zeros((1, CPAD), f32)
    b2 = b2.at[0, 0:50].set(p["cnv_clt2_b"] * sc2 + tc2)
    b2 = b2.at[0, 50:100].set(p["cnv_tgt2_b"] * st2 + tt2)

    # Layer 3: block diag clt2->clt3 / tgt2->tgt3 with the post-concat BN(100)
    # folded per output channel (cat order = [clt, tgt], exactly as torch.cat).
    sbn, tbn = _bn_fold(p["bn"])
    wc3 = jnp.transpose(p["cnv_clt3_w"], (2, 3, 1, 0)).reshape(9, 50, 50)
    wt3 = jnp.transpose(p["cnv_tgt3_w"], (2, 3, 1, 0)).reshape(9, 50, 50)
    w3 = jnp.zeros((9, CPAD, CPAD), f32)
    w3 = w3.at[:, 0:50, 0:50].set(wc3 * sbn[None, None, :50])
    w3 = w3.at[:, 50:100, 50:100].set(wt3 * sbn[None, None, 50:])
    b3 = jnp.zeros((1, CPAD), f32)
    b3 = b3.at[0, 0:50].set(p["cnv_clt3_b"] * sbn[:50] + tbn[:50])
    b3 = b3.at[0, 50:100].set(p["cnv_tgt3_b"] * sbn[50:] + tbn[50:])

    # Layer 4: 1x1 conv, 100 -> 1 (column 0 of the padded matrix).
    w4 = jnp.zeros((CPAD, CPAD), f32)
    w4 = w4.at[0:100, 0].set(p["cnv4_w"][0, :, 0, 0])
    b4 = jnp.zeros((1, CPAD), f32)
    b4 = b4.at[0, 0].set(p["cnv4_b"][0])

    bf16 = jnp.bfloat16
    return dict(w1=w1.astype(bf16), b1=b1, w2=w2.astype(bf16), b2=b2,
                w3=w3.astype(bf16), b3=b3, w4=w4.astype(bf16), b4=b4)


# ----------------------------------------------------------------------------
# Forward wrapper (single pallas_call, grid over the batch)
# ----------------------------------------------------------------------------
@jax.jit
def tcrnet_forward(x_nchw, p):
    n, cin, h, w = x_nchw.shape
    assert cin == 1
    ho1, wo1 = h - KH1 + 1, w - KW1 + 1
    ho3, wo3 = ho1 - 4, wo1 - 4
    r_img = ho1 * wo1
    r3 = (ho3 - 1) * wo1 + wo3                 # 1-D rows holding the final conv output
    r3p = _round_up(r3, 8)
    r2 = r3p + 2 * wo1 + 2                     # layer-2 rows required by layer 3
    r1 = _round_up(max(r_img, r2 + 2 * wo1 + 2), 8)

    ops = fold_params(p)                       # in deployment: fold once, reuse

    # Layer-1 im2col patches (Cin=1 -> feature order (kh, kw)); a single conv
    # op, no gather HLO.  Rows are (h1*Wo1 + w1) per image, zero-padded to r1.
    patches = lax.conv_general_dilated_patches(
        x_nchw.astype(jnp.float32), (KH1, KW1), (1, 1), "VALID",
        dimension_numbers=("NCHW", "OIHW", "NCHW"))          # (N, 800, Ho1, Wo1)
    patches = jnp.transpose(patches, (0, 2, 3, 1)).reshape(n, r_img, K1)
    x1 = jnp.zeros((n, r1, K1P), jnp.bfloat16)
    x1 = x1.at[:, :r_img, :K1].set(patches.astype(jnp.bfloat16))
    x1 = x1.reshape(n * r1, K1P)

    kernel = functools.partial(_tcrnet_kernel, wo1=wo1, r2=r2, r3p=r3p)
    out = pl.pallas_call(
        kernel,
        out_shape=jax.ShapeDtypeStruct((n * r3p, CPAD), jnp.float32),
        grid=(n,),
        in_specs=[
            pl.BlockSpec((r1, K1P), lambda i: (i, 0)),           # per-image patches
            pl.BlockSpec((K1P, CPAD), lambda i: (0, 0)),         # w1
            pl.BlockSpec((1, CPAD), lambda i: (0, 0)),           # b1
            pl.BlockSpec((9, CPAD, CPAD), lambda i: (0, 0, 0)),  # w2 (9 taps)
            pl.BlockSpec((1, CPAD), lambda i: (0, 0)),           # b2
            pl.BlockSpec((9, CPAD, CPAD), lambda i: (0, 0, 0)),  # w3 (9 taps)
            pl.BlockSpec((1, CPAD), lambda i: (0, 0)),           # b3
            pl.BlockSpec((CPAD, CPAD), lambda i: (0, 0)),        # w4
            pl.BlockSpec((1, CPAD), lambda i: (0, 0)),           # b4
        ],
        out_specs=pl.BlockSpec((r3p, CPAD), lambda i: (i, 0)),
        scratch_shapes=[pltpu.VMEM((r1, CPAD), jnp.float32),     # layer-1 activation
                        pltpu.VMEM((r2, CPAD), jnp.float32)],    # layer-2 activation
        compiler_params=pltpu.CompilerParams(
            dimension_semantics=("parallel",)),
    )(x1, ops["w1"], ops["b1"], ops["w2"], ops["b2"],
      ops["w3"], ops["b3"], ops["w4"], ops["b4"])

    # Extract valid output rows q = h3*Wo1 + w3 (channel 0 holds the cnv4 output).
    y = out[:, 0].reshape(n, r3p)[:, :r3]
    y = jnp.pad(y, ((0, 0), (0, ho3 * wo1 - r3)))
    y = y.reshape(n, ho3, wo1)[:, :, :wo3]
    return y[:, None, :, :]                    # NCHW, Cout = 1


# ----------------------------------------------------------------------------
# Pure-JAX f32 reference (un-folded) for verification
# ----------------------------------------------------------------------------
def _conv_ref(x, w, b):
    y = lax.conv_general_dilated(
        x, w, (1, 1), "VALID",
        dimension_numbers=("NCHW", "OIHW", "NCHW"),
        precision=lax.Precision.HIGHEST)
    return y + b[None, :, None, None]


def _bn_ref(x, bn):
    g, b, m, v = (a[None, :, None, None] for a in bn)
    return (x - m) / jnp.sqrt(v + EPS) * g + b


def _leaky(x, s):
    return jnp.where(x >= 0, x, s * x)


@jax.jit
def tcrnet_ref(x, p):
    xt = _leaky(_bn_ref(_conv_ref(x, p["cnv_tgt_w"], p["cnv_tgt_b"]), p["tgt_bn1"]), 0.1)
    xt = _leaky(_bn_ref(_conv_ref(xt, p["cnv_tgt2_w"], p["cnv_tgt2_b"]), p["tgt_bn2"]), 0.1)
    xt = _conv_ref(xt, p["cnv_tgt3_w"], p["cnv_tgt3_b"])
    xc = _leaky(_bn_ref(_conv_ref(x, p["cnv_clt_w"], p["cnv_clt_b"]), p["clt_bn1"]), 0.1)
    xc = _leaky(_bn_ref(_conv_ref(xc, p["cnv_clt2_w"], p["cnv_clt2_b"]), p["clt_bn2"]), 0.1)
    xc = _conv_ref(xc, p["cnv_clt3_w"], p["cnv_clt3_b"])
    comb = jnp.concatenate([xc, xt], axis=1)
    comb = _leaky(_bn_ref(comb, p["bn"]), 0.01)
    return _conv_ref(comb, p["cnv4_w"], p["cnv4_b"])


# ----------------------------------------------------------------------------
# Deterministic parameter init (shapes from tcrNet.__init__)
# ----------------------------------------------------------------------------
def init_params(key):
    keys = iter(jax.random.split(key, 64))

    def conv(cout, cin, kh, kw):
        w = jax.random.normal(next(keys), (cout, cin, kh, kw), jnp.float32)
        w = w / math.sqrt(cin * kh * kw)
        b = 0.1 * jax.random.normal(next(keys), (cout,), jnp.float32)
        return w, b

    def bn(c):
        g = 1.0 + 0.1 * jax.random.normal(next(keys), (c,), jnp.float32)
        be = 0.1 * jax.random.normal(next(keys), (c,), jnp.float32)
        m = 0.1 * jax.random.normal(next(keys), (c,), jnp.float32)
        v = 0.5 + jax.random.uniform(next(keys), (c,), jnp.float32)
        return (g, be, m, v)

    p = {}
    p["cnv_tgt_w"], p["cnv_tgt_b"] = conv(70, 1, 20, 40)   # stands in for target_filters.npy
    p["tgt_bn1"] = bn(70)
    p["cnv_tgt2_w"], p["cnv_tgt2_b"] = conv(50, 70, 3, 3)
    p["tgt_bn2"] = bn(50)
    p["cnv_tgt3_w"], p["cnv_tgt3_b"] = conv(50, 50, 3, 3)
    p["cnv_clt_w"], p["cnv_clt_b"] = conv(30, 1, 20, 40)   # stands in for clutter_filters.npy
    p["clt_bn1"] = bn(30)
    p["cnv_clt2_w"], p["cnv_clt2_b"] = conv(50, 30, 3, 3)
    p["clt_bn2"] = bn(50)
    p["cnv_clt3_w"], p["cnv_clt3_b"] = conv(50, 50, 3, 3)
    p["bn"] = bn(100)
    p["cnv4_w"], p["cnv4_b"] = conv(1, 100, 1, 1)
    return p


if __name__ == "__main__":
    key = jax.random.PRNGKey(0)
    pkey, xkey = jax.random.split(key)
    params = init_params(pkey)

    # NCHW input, single channel; >= (24, 44) spatially for the VALID convs.
    x = jax.random.normal(xkey, (2, 1, 24, 48), jnp.float32)

    out = jax.block_until_ready(tcrnet_forward(x, params))
    ref = jax.block_until_ready(tcrnet_ref(x, params))

    assert out.shape == (2, 1, 1, 5), out.shape
    # bf16-MXU matmuls vs. an f32 HIGHEST reference: allow bf16-level error.
    err = float(jnp.max(jnp.abs(out - ref)))
    assert err < 5e-2, err
    print("KERNEL_OK")
</pallas_src>

<mosaic_0001>
module attributes {stable_mosaic.version = 11 : i64} {
  func.func @_tcrnet_kernel(%arg0: i32, %arg1: memref<48x896xbf16, #tpu.memory_space<vmem>>, %arg2: memref<896x128xbf16, #tpu.memory_space<vmem>>, %arg3: memref<1x128xf32, #tpu.memory_space<vmem>>, %arg4: memref<9x128x128xbf16, #tpu.memory_space<vmem>>, %arg5: memref<1x128xf32, #tpu.memory_space<vmem>>, %arg6: memref<9x128x128xbf16, #tpu.memory_space<vmem>>, %arg7: memref<1x128xf32, #tpu.memory_space<vmem>>, %arg8: memref<128x128xbf16, #tpu.memory_space<vmem>>, %arg9: memref<1x128xf32, #tpu.memory_space<vmem>>, %arg10: memref<8x128xf32, #tpu.memory_space<vmem>>, %arg11: memref<48x128xf32, #tpu.memory_space<vmem>>, %arg12: memref<28x128xf32, #tpu.memory_space<vmem>>) attributes {dimension_semantics = [#tpu.dimension_semantics<parallel>], iteration_bounds = array<i64: 2>, scalar_prefetch = 0 : i64, scratch_operands = 2 : i64, tpu.core_type = #tpu.core_type<tc>, window_params = [{transform_indices = @transform_0, window_bounds = array<i64: 48, 896>}, {pipeline_mode = #tpu.pipeline_mode<synchronous>, transform_indices = @transform_1, window_bounds = array<i64: 896, 128>}, {pipeline_mode = #tpu.pipeline_mode<synchronous>, transform_indices = @transform_2, window_bounds = array<i64: 1, 128>}, {pipeline_mode = #tpu.pipeline_mode<synchronous>, transform_indices = @transform_3, window_bounds = array<i64: 9, 128, 128>}, {pipeline_mode = #tpu.pipeline_mode<synchronous>, transform_indices = @transform_4, window_bounds = array<i64: 1, 128>}, {pipeline_mode = #tpu.pipeline_mode<synchronous>, transform_indices = @transform_5, window_bounds = array<i64: 9, 128, 128>}, {pipeline_mode = #tpu.pipeline_mode<synchronous>, transform_indices = @transform_6, window_bounds = array<i64: 1, 128>}, {pipeline_mode = #tpu.pipeline_mode<synchronous>, transform_indices = @transform_7, window_bounds = array<i64: 128, 128>}, {pipeline_mode = #tpu.pipeline_mode<synchronous>, transform_indices = @transform_8, window_bounds = array<i64: 1, 128>}, {transform_indices = @transform_9, window_bounds = array<i64: 8, 128>}]} {
    %c0 = arith.constant 0 : index
    %c0_0 = arith.constant 0 : index
    %0 = vector.load %arg1[%c0, %c0_0] : memref<48x896xbf16, #tpu.memory_space<vmem>>, vector<48x896xbf16>
    %c0_1 = arith.constant 0 : index
    %c0_2 = arith.constant 0 : index
    %1 = vector.load %arg2[%c0_1, %c0_2] : memref<896x128xbf16, #tpu.memory_space<vmem>>, vector<896x128xbf16>
    %cst = arith.constant dense<0.000000e+00> : vector<48x128xf32>
    %2 = tpu.matmul %0, %1, %cst {dimension_numbers = #tpu.dot_dimension_numbers<[1], [0], [0], [1], [0, 0, 1, 1], [], []>} : vector<48x896xbf16>, vector<896x128xbf16>, vector<48x128xf32> -> vector<48x128xf32>
    %c0_3 = arith.constant 0 : index
    %c0_4 = arith.constant 0 : index
    %3 = vector.load %arg3[%c0_3, %c0_4] : memref<1x128xf32, #tpu.memory_space<vmem>>, vector<1x128xf32>
    %4 = vector.broadcast %3 : vector<1x128xf32> to vector<48x128xf32>
    %5 = arith.addf %2, %4 : vector<48x128xf32>
    %cst_5 = arith.constant 0.000000e+00 : f32
    %6 = vector.broadcast %cst_5 : f32 to vector<48x128xf32>
    %7 = arith.cmpf oge, %5, %6 : vector<48x128xf32>
    %cst_6 = arith.constant 1.000000e-01 : f32
    %8 = vector.broadcast %cst_6 : f32 to vector<48x128xf32>
    %9 = arith.mulf %8, %5 : vector<48x128xf32>
    %10 = arith.select %7, %5, %9 : vector<48x128xi1>, vector<48x128xf32>
    %c0_7 = arith.constant 0 : index
    %c0_8 = arith.constant 0 : index
    %11 = vector.load %arg11[%c0_7, %c0_8] : memref<48x128xf32, #tpu.memory_space<vmem>>, vector<48x128xf32>
    tpu.vector_store %arg11[%c0_7, %c0_8], %10 {strides = array<i32>} : memref<48x128xf32, #tpu.memory_space<vmem>>, vector<48x128xf32>,
    %cst_9 = arith.constant 0.000000e+00 : f32
    %12 = vector.broadcast %cst_9 : f32 to vector<28x128xf32>
    %c0_10 = arith.constant 0 : index
    %c0_11 = arith.constant 0 : index
    %13 = vector.load %arg11[%c0_10, %c0_11] : memref<48x128xf32, #tpu.memory_space<vmem>>, vector<28x128xf32>
    %14 = arith.truncf %13 : vector<28x128xf32> to vector<28x128xbf16>
    %c0_12 = arith.constant 0 : index
    %c0_13 = arith.constant 0 : index
    %c0_14 = arith.constant 0 : index
    %15 = vector.load %arg4[%c0_12, %c0_13, %c0_14] : memref<9x128x128xbf16, #tpu.memory_space<vmem>>, vector<1x128x128xbf16>
    %16 = vector.shape_cast %15 : vector<1x128x128xbf16> to vector<128x128xbf16>
    %cst_15 = arith.constant dense<0.000000e+00> : vector<28x128xf32>
    %17 = tpu.matmul %14, %16, %cst_15 {dimension_numbers = #tpu.dot_dimension_numbers<[1], [0], [0], [1], [0, 0, 1, 1], [], []>} : vector<28x128xbf16>, vector<128x128xbf16>, vector<28x128xf32> -> vector<28x128xf32>
    %18 = arith.addf %12, %17 : vector<28x128xf32>
    %c1 = arith.constant 1 : index
    %c0_16 = arith.constant 0 : index
    %19 = vector.load %arg11[%c1, %c0_16] : memref<48x128xf32, #tpu.memory_space<vmem>>, vector<28x128xf32>
    %20 = arith.truncf %19 : vector<28x128xf32> to vector<28x128xbf16>
    %c1_17 = arith.constant 1 : index
    %c0_18 = arith.constant 0 : index
    %c0_19 = arith.constant 0 : index
    %21 = vector.load %arg4[%c1_17, %c0_18, %c0_19] : memref<9x128x128xbf16, #tpu.memory_space<vmem>>, vector<1x128x128xbf16>
    %22 = vector.shape_cast %21 : vector<1x128x128xbf16> to vector<128x128xbf16>
    %cst_20 = arith.constant dense<0.000000e+00> : vector<28x128xf32>
    %23 = tpu.matmul %20, %22, %cst_20 {dimension_numbers = #tpu.dot_dimension_numbers<[1], [0], [0], [1], [0, 0, 1, 1], [], []>} : vector<28x128xbf16>, vector<128x128xbf16>, vector<28x128xf32> -> vector<28x128xf32>
    %24 = arith.addf %18, %23 : vector<28x128xf32>
    %c2 = arith.constant 2 : index
    %c0_21 = arith.constant 0 : index
    %25 = vector.load %arg11[%c2, %c0_21] : memref<48x128xf32, #tpu.memory_space<vmem>>, vector<28x128xf32>
    %26 = arith.truncf %25 : vector<28x128xf32> to vector<28x128xbf16>
    %c2_22 = arith.constant 2 : index
    %c0_23 = arith.constant 0 : index
    %c0_24 = arith.constant 0 : index
    %27 = vector.load %arg4[%c2_22, %c0_23, %c0_24] : memref<9x128x128xbf16, #tpu.memory_space<vmem>>, vector<1x128x128xbf16>
    %28 = vector.shape_cast %27 : vector<1x128x128xbf16> to vector<128x128xbf16>
    %cst_25 = arith.constant dense<0.000000e+00> : vector<28x128xf32>
    %29 = tpu.matmul %26, %28, %cst_25 {dimension_numbers = #tpu.dot_dimension_numbers<[1], [0], [0], [1], [0, 0, 1, 1], [], []>} : vector<28x128xbf16>, vector<128x128xbf16>, vector<28x128xf32> -> vector<28x128xf32>
    %30 = arith.addf %24, %29 : vector<28x128xf32>
    %c9 = arith.constant 9 : index
    %c0_26 = arith.constant 0 : index
    %31 = vector.load %arg11[%c9, %c0_26] : memref<48x128xf32, #tpu.memory_space<vmem>>, vector<28x128xf32>
    %32 = arith.truncf %31 : vector<28x128xf32> to vector<28x128xbf16>
    %c3 = arith.constant 3 : index
    %c0_27 = arith.constant 0 : index
    %c0_28 = arith.constant 0 : index
    %33 = vector.load %arg4[%c3, %c0_27, %c0_28] : memref<9x128x128xbf16, #tpu.memory_space<vmem>>, vector<1x128x128xbf16>
    %34 = vector.shape_cast %33 : vector<1x128x128xbf16> to vector<128x128xbf16>
    %cst_29 = arith.constant dense<0.000000e+00> : vector<28x128xf32>
    %35 = tpu.matmul %32, %34, %cst_29 {dimension_numbers = #tpu.dot_dimension_numbers<[1], [0], [0], [1], [0, 0, 1, 1], [], []>} : vector<28x128xbf16>, vector<128x128xbf16>, vector<28x128xf32> -> vector<28x128xf32>
    %36 = arith.addf %30, %35 : vector<28x128xf32>
    %c10 = arith.constant 10 : index
    %c0_30 = arith.constant 0 : index
    %37 = vector.load %arg11[%c10, %c0_30] : memref<48x128xf32, #tpu.memory_space<vmem>>, vector<28x128xf32>
    %38 = arith.truncf %37 : vector<28x128xf32> to vector<28x128xbf16>
    %c4 = arith.constant 4 : index
    %c0_31 = arith.constant 0 : index
    %c0_32 = arith.constant 0 : index
    %39 = vector.load %arg4[%c4, %c0_31, %c0_32] : memref<9x128x128xbf16, #tpu.memory_space<vmem>>, vector<1x128x128xbf16>
    %40 = vector.shape_cast %39 : vector<1x128x128xbf16> to vector<128x128xbf16>
    %cst_33 = arith.constant dense<0.000000e+00> : vector<28x128xf32>
    %41 = tpu.matmul %38, %40, %cst_33 {dimension_numbers = #tpu.dot_dimension_numbers<[1], [0], [0], [1], [0, 0, 1, 1], [], []>} : vector<28x128xbf16>, vector<128x128xbf16>, vector<28x128xf32> -> vector<28x128xf32>
    %42 = arith.addf %36, %41 : vector<28x128xf32>
    %c11 = arith.constant 11 : index
    %c0_34 = arith.constant 0 : index
    %43 = vector.load %arg11[%c11, %c0_34] : memref<48x128xf32, #tpu.memory_space<vmem>>, vector<28x128xf32>
    %44 = arith.truncf %43 : vector<28x128xf32> to vector<28x128xbf16>
    %c5 = arith.constant 5 : index
    %c0_35 = arith.constant 0 : index
    %c0_36 = arith.constant 0 : index
    %45 = vector.load %arg4[%c5, %c0_35, %c0_36] : memref<9x128x128xbf16, #tpu.memory_space<vmem>>, vector<1x128x128xbf16>
    %46 = vector.shape_cast %45 : vector<1x128x128xbf16> to vector<128x128xbf16>
    %cst_37 = arith.constant dense<0.000000e+00> : vector<28x128xf32>
    %47 = tpu.matmul %44, %46, %cst_37 {dimension_numbers = #tpu.dot_dimension_numbers<[1], [0], [0], [1], [0, 0, 1, 1], [], []>} : vector<28x128xbf16>, vector<128x128xbf16>, vector<28x128xf32> -> vector<28x128xf32>
    %48 = arith.addf %42, %47 : vector<28x128xf32>
    %c18 = arith.constant 18 : index
    %c0_38 = arith.constant 0 : index
    %49 = vector.load %arg11[%c18, %c0_38] : memref<48x128xf32, #tpu.memory_space<vmem>>, vector<28x128xf32>
    %50 = arith.truncf %49 : vector<28x128xf32> to vector<28x128xbf16>
    %c6 = arith.constant 6 : index
    %c0_39 = arith.constant 0 : index
    %c0_40 = arith.constant 0 : index
    %51 = vector.load %arg4[%c6, %c0_39, %c0_40] : memref<9x128x128xbf16, #tpu.memory_space<vmem>>, vector<1x128x128xbf16>
    %52 = vector.shape_cast %51 : vector<1x128x128xbf16> to vector<128x128xbf16>
    %cst_41 = arith.constant dense<0.000000e+00> : vector<28x128xf32>
    %53 = tpu.matmul %50, %52, %cst_41 {dimension_numbers = #tpu.dot_dimension_numbers<[1], [0], [0], [1], [0, 0, 1, 1], [], []>} : vector<28x128xbf16>, vector<128x128xbf16>, vector<28x128xf32> -> vector<28x128xf32>
    %54 = arith.addf %48, %53 : vector<28x128xf32>
    %c19 = arith.constant 19 : index
    %c0_42 = arith.constant 0 : index
    %55 = vector.load %arg11[%c19, %c0_42] : memref<48x128xf32, #tpu.memory_space<vmem>>, vector<28x128xf32>
    %56 = arith.truncf %55 : vector<28x128xf32> to vector<28x128xbf16>
    %c7 = arith.constant 7 : index
    %c0_43 = arith.constant 0 : index
    %c0_44 = arith.constant 0 : index
    %57 = vector.load %arg4[%c7, %c0_43, %c0_44] : memref<9x128x128xbf16, #tpu.memory_space<vmem>>, vector<1x128x128xbf16>
    %58 = vector.shape_cast %57 : vector<1x128x128xbf16> to vector<128x128xbf16>
    %cst_45 = arith.constant dense<0.000000e+00> : vector<28x128xf32>
    %59 = tpu.matmul %56, %58, %cst_45 {dimension_numbers = #tpu.dot_dimension_numbers<[1], [0], [0], [1], [0, 0, 1, 1], [], []>} : vector<28x128xbf16>, vector<128x128xbf16>, vector<28x128xf32> -> vector<28x128xf32>
    %60 = arith.addf %54, %59 : vector<28x128xf32>
    %c20 = arith.constant 20 : index
    %c0_46 = arith.constant 0 : index
    %61 = vector.load %arg11[%c20, %c0_46] : memref<48x128xf32, #tpu.memory_space<vmem>>, vector<28x128xf32>
    %62 = arith.truncf %61 : vector<28x128xf32> to vector<28x128xbf16>
    %c8 = arith.constant 8 : index
    %c0_47 = arith.constant 0 : index
    %c0_48 = arith.constant 0 : index
    %63 = vector.load %arg4[%c8, %c0_47, %c0_48] : memref<9x128x128xbf16, #tpu.memory_space<vmem>>, vector<1x128x128xbf16>
    %64 = vector.shape_cast %63 : vector<1x128x128xbf16> to vector<128x128xbf16>
    %cst_49 = arith.constant dense<0.000000e+00> : vector<28x128xf32>
    %65 = tpu.matmul %62, %64, %cst_49 {dimension_numbers = #tpu.dot_dimension_numbers<[1], [0], [0], [1], [0, 0, 1, 1], [], []>} : vector<28x128xbf16>, vector<128x128xbf16>, vector<28x128xf32> -> vector<28x128xf32>
    %66 = arith.addf %60, %65 : vector<28x128xf32>
    %c0_50 = arith.constant 0 : index
    %c0_51 = arith.constant 0 : index
    %67 = vector.load %arg5[%c0_50, %c0_51] : memref<1x128xf32, #tpu.memory_space<vmem>>, vector<1x128xf32>
    %68 = vector.broadcast %67 : vector<1x128xf32> to vector<28x128xf32>
    %69 = arith.addf %66, %68 : vector<28x128xf32>
    %cst_52 = arith.constant 0.000000e+00 : f32
    %70 = vector.broadcast %cst_52 : f32 to vector<28x128xf32>
    %71 = arith.cmpf oge, %69, %70 : vector<28x128xf32>
    %cst_53 = arith.constant 1.000000e-01 : f32
    %72 = vector.broadcast %cst_53 : f32 to vector<28x128xf32>
    %73 = arith.mulf %72, %69 : vector<28x128xf32>
    %74 = arith.select %71, %69, %73 : vector<28x128xi1>, vector<28x128xf32>
    %c0_54 = arith.constant 0 : index
    %c0_55 = arith.constant 0 : index
    %75 = vector.load %arg12[%c0_54, %c0_55] : memref<28x128xf32, #tpu.memory_space<vmem>>, vector<28x128xf32>
    tpu.vector_store %arg12[%c0_54, %c0_55], %74 {strides = array<i32>} : memref<28x128xf32, #tpu.memory_space<vmem>>, vector<28x128xf32>,
    %cst_56 = arith.constant 0.000000e+00 : f32
    %76 = vector.broadcast %cst_56 : f32 to vector<8x128xf32>
    %c0_57 = arith.constant 0 : index
    %c0_58 = arith.constant 0 : index
    %77 = vector.load %arg12[%c0_57, %c0_58] : memref<28x128xf32, #tpu.memory_space<vmem>>, vector<8x128xf32>
    %78 = arith.truncf %77 : vector<8x128xf32> to vector<8x128xbf16>
    %c0_59 = arith.constant 0 : index
    %c0_60 = arith.constant 0 : index
    %c0_61 = arith.constant 0 : index
    %79 = vector.load %arg6[%c0_59, %c0_60, %c0_61] : memref<9x128x128xbf16, #tpu.memory_space<vmem>>, vector<1x128x128xbf16>
    %80 = vector.shape_cast %79 : vector<1x128x128xbf16> to vector<128x128xbf16>
    %cst_62 = arith.constant dense<0.000000e+00> : vector<8x128xf32>
    %81 = tpu.matmul %78, %80, %cst_62 {dimension_numbers = #tpu.dot_dimension_numbers<[1], [0], [0], [1], [0, 0, 1, 1], [], []>} : vector<8x128xbf16>, vector<128x128xbf16>, vector<8x128xf32> -> vector<8x128xf32>
    %82 = arith.addf %76, %81 : vector<8x128xf32>
    %c1_63 = arith.constant 1 : index
    %c0_64 = arith.constant 0 : index
    %83 = vector.load %arg12[%c1_63, %c0_64] : memref<28x128xf32, #tpu.memory_space<vmem>>, vector<8x128xf32>
    %84 = arith.truncf %83 : vector<8x128xf32> to vector<8x128xbf16>
    %c1_65 = arith.constant 1 : index
    %c0_66 = arith.constant 0 : index
    %c0_67 = arith.constant 0 : index
    %85 = vector.load %arg6[%c1_65, %c0_66, %c0_67] : memref<9x128x128xbf16, #tpu.memory_space<vmem>>, vector<1x128x128xbf16>
    %86 = vector.shape_cast %85 : vector<1x128x128xbf16> to vector<128x128xbf16>
    %cst_68 = arith.constant dense<0.000000e+00> : vector<8x128xf32>
    %87 = tpu.matmul %84, %86, %cst_68 {dimension_numbers = #tpu.dot_dimension_numbers<[1], [0], [0], [1], [0, 0, 1, 1], [], []>} : vector<8x128xbf16>, vector<128x128xbf16>, vector<8x128xf32> -> vector<8x128xf32>
    %88 = arith.addf %82, %87 : vector<8x128xf32>
    %c2_69 = arith.constant 2 : index
    %c0_70 = arith.constant 0 : index
    %89 = vector.load %arg12[%c2_69, %c0_70] : memref<28x128xf32, #tpu.memory_space<vmem>>, vector<8x128xf32>
    %90 = arith.truncf %89 : vector<8x128xf32> to vector<8x128xbf16>
    %c2_71 = arith.constant 2 : index
    %c0_72 = arith.constant 0 : index
    %c0_73 = arith.constant 0 : index
    %91 = vector.load %arg6[%c2_71, %c0_72, %c0_73] : memref<9x128x128xbf16, #tpu.memory_space<vmem>>, vector<1x128x128xbf16>
    %92 = vector.shape_cast %91 : vector<1x128x128xbf16> to vector<128x128xbf16>
    %cst_74 = arith.constant dense<0.000000e+00> : vector<8x128xf32>
    %93 = tpu.matmul %90, %92, %cst_74 {dimension_numbers = #tpu.dot_dimension_numbers<[1], [0], [0], [1], [0, 0, 1, 1], [], []>} : vector<8x128xbf16>, vector<128x128xbf16>, vector<8x128xf32> -> vector<8x128xf32>
    %94 = arith.addf %88, %93 : vector<8x128xf32>
    %c9_75 = arith.constant 9 : index
    %c0_76 = arith.constant 0 : index
    %95 = vector.load %arg12[%c9_75, %c0_76] : memref<28x128xf32, #tpu.memory_space<vmem>>, vector<8x128xf32>
    %96 = arith.truncf %95 : vector<8x128xf32> to vector<8x128xbf16>
    %c3_77 = arith.constant 3 : index
    %c0_78 = arith.constant 0 : index
    %c0_79 = arith.constant 0 : index
    %97 = vector.load %arg6[%c3_77, %c0_78, %c0_79] : memref<9x128x128xbf16, #tpu.memory_space<vmem>>, vector<1x128x128xbf16>
    %98 = vector.shape_cast %97 : vector<1x128x128xbf16> to vector<128x128xbf16>
    %cst_80 = arith.constant dense<0.000000e+00> : vector<8x128xf32>
    %99 = tpu.matmul %96, %98, %cst_80 {dimension_numbers = #tpu.dot_dimension_numbers<[1], [0], [0], [1], [0, 0, 1, 1], [], []>} : vector<8x128xbf16>, vector<128x128xbf16>, vector<8x128xf32> -> vector<8x128xf32>
    %100 = arith.addf %94, %99 : vector<8x128xf32>
    %c10_81 = arith.constant 10 : index
    %c0_82 = arith.constant 0 : index
    %101 = vector.load %arg12[%c10_81, %c0_82] : memref<28x128xf32, #tpu.memory_space<vmem>>, vector<8x128xf32>
    %102 = arith.truncf %101 : vector<8x128xf32> to vector<8x128xbf16>
    %c4_83 = arith.constant 4 : index
    %c0_84 = arith.constant 0 : index
    %c0_85 = arith.constant 0 : index
    %103 = vector.load %arg6[%c4_83, %c0_84, %c0_85] : memref<9x128x128xbf16, #tpu.memory_space<vmem>>, vector<1x128x128xbf16>
    %104 = vector.shape_cast %103 : vector<1x128x128xbf16> to vector<128x128xbf16>
    %cst_86 = arith.constant dense<0.000000e+00> : vector<8x128xf32>
    %105 = tpu.matmul %102, %104, %cst_86 {dimension_numbers = #tpu.dot_dimension_numbers<[1], [0], [0], [1], [0, 0, 1, 1], [], []>} : vector<8x128xbf16>, vector<128x128xbf16>, vector<8x128xf32> -> vector<8x128xf32>
    %106 = arith.addf %100, %105 : vector<8x128xf32>
    %c11_87 = arith.constant 11 : index
    %c0_88 = arith.constant 0 : index
    %107 = vector.load %arg12[%c11_87, %c0_88] : memref<28x128xf32, #tpu.memory_space<vmem>>, vector<8x128xf32>
    %108 = arith.truncf %107 : vector<8x128xf32> to vector<8x128xbf16>
    %c5_89 = arith.constant 5 : index
    %c0_90 = arith.constant 0 : index
    %c0_91 = arith.constant 0 : index
    %109 = vector.load %arg6[%c5_89, %c0_90, %c0_91] : memref<9x128x128xbf16, #tpu.memory_space<vmem>>, vector<1x128x128xbf16>
    %110 = vector.shape_cast %109 : vector<1x128x128xbf16> to vector<128x128xbf16>
    %cst_92 = arith.constant dense<0.000000e+00> : vector<8x128xf32>
    %111 = tpu.matmul %108, %110, %cst_92 {dimension_numbers = #tpu.dot_dimension_numbers<[1], [0], [0], [1], [0, 0, 1, 1], [], []>} : vector<8x128xbf16>, vector<128x128xbf16>, vector<8x128xf32> -> vector<8x128xf32>
    %112 = arith.addf %106, %111 : vector<8x128xf32>
    %c18_93 = arith.constant 18 : index
    %c0_94 = arith.constant 0 : index
    %113 = vector.load %arg12[%c18_93, %c0_94] : memref<28x128xf32, #tpu.memory_space<vmem>>, vector<8x128xf32>
    %114 = arith.truncf %113 : vector<8x128xf32> to vector<8x128xbf16>
    %c6_95 = arith.constant 6 : index
    %c0_96 = arith.constant 0 : index
    %c0_97 = arith.constant 0 : index
    %115 = vector.load %arg6[%c6_95, %c0_96, %c0_97] : memref<9x128x128xbf16, #tpu.memory_space<vmem>>, vector<1x128x128xbf16>
    %116 = vector.shape_cast %115 : vector<1x128x128xbf16> to vector<128x128xbf16>
    %cst_98 = arith.constant dense<0.000000e+00> : vector<8x128xf32>
    %117 = tpu.matmul %114, %116, %cst_98 {dimension_numbers = #tpu.dot_dimension_numbers<[1], [0], [0], [1], [0, 0, 1, 1], [], []>} : vector<8x128xbf16>, vector<128x128xbf16>, vector<8x128xf32> -> vector<8x128xf32>
    %118 = arith.addf %112, %117 : vector<8x128xf32>
    %c19_99 = arith.constant 19 : index
    %c0_100 = arith.constant 0 : index
    %119 = vector.load %arg12[%c19_99, %c0_100] : memref<28x128xf32, #tpu.memory_space<vmem>>, vector<8x128xf32>
    %120 = arith.truncf %119 : vector<8x128xf32> to vector<8x128xbf16>
    %c7_101 = arith.constant 7 : index
    %c0_102 = arith.constant 0 : index
    %c0_103 = arith.constant 0 : index
    %121 = vector.load %arg6[%c7_101, %c0_102, %c0_103] : memref<9x128x128xbf16, #tpu.memory_space<vmem>>, vector<1x128x128xbf16>
    %122 = vector.shape_cast %121 : vector<1x128x128xbf16> to vector<128x128xbf16>
    %cst_104 = arith.constant dense<0.000000e+00> : vector<8x128xf32>
    %123 = tpu.matmul %120, %122, %cst_104 {dimension_numbers = #tpu.dot_dimension_numbers<[1], [0], [0], [1], [0, 0, 1, 1], [], []>} : vector<8x128xbf16>, vector<128x128xbf16>, vector<8x128xf32> -> vector<8x128xf32>
    %124 = arith.addf %118, %123 : vector<8x128xf32>
    %c20_105 = arith.constant 20 : index
    %c0_106 = arith.constant 0 : index
    %125 = vector.load %arg12[%c20_105, %c0_106] : memref<28x128xf32, #tpu.memory_space<vmem>>, vector<8x128xf32>
    %126 = arith.truncf %125 : vector<8x128xf32> to vector<8x128xbf16>
    %c8_107 = arith.constant 8 : index
    %c0_108 = arith.constant 0 : index
    %c0_109 = arith.constant 0 : index
    %127 = vector.load %arg6[%c8_107, %c0_108, %c0_109] : memref<9x128x128xbf16, #tpu.memory_space<vmem>>, vector<1x128x128xbf16>
    %128 = vector.shape_cast %127 : vector<1x128x128xbf16> to vector<128x128xbf16>
    %cst_110 = arith.constant dense<0.000000e+00> : vector<8x128xf32>
    %129 = tpu.matmul %126, %128, %cst_110 {dimension_numbers = #tpu.dot_dimension_numbers<[1], [0], [0], [1], [0, 0, 1, 1], [], []>} : vector<8x128xbf16>, vector<128x128xbf16>, vector<8x128xf32> -> vector<8x128xf32>
    %130 = arith.addf %124, %129 : vector<8x128xf32>
    %c0_111 = arith.constant 0 : index
    %c0_112 = arith.constant 0 : index
    %131 = vector.load %arg7[%c0_111, %c0_112] : memref<1x128xf32, #tpu.memory_space<vmem>>, vector<1x128xf32>
    %132 = vector.broadcast %131 : vector<1x128xf32> to vector<8x128xf32>
    %133 = arith.addf %130, %132 : vector<8x128xf32>
    %cst_113 = arith.constant 0.000000e+00 : f32
    %134 = vector.broadcast %cst_113 : f32 to vector<8x128xf32>
    %135 = arith.cmpf oge, %133, %134 : vector<8x128xf32>
    %cst_114 = arith.constant 0.00999999977 : f32
    %136 = vector.broadcast %cst_114 : f32 to vector<8x128xf32>
    %137 = arith.mulf %136, %133 : vector<8x128xf32>
    %138 = arith.select %135, %133, %137 : vector<8x128xi1>, vector<8x128xf32>
    %139 = arith.truncf %138 : vector<8x128xf32> to vector<8x128xbf16>
    %c0_115 = arith.constant 0 : index
    %c0_116 = arith.constant 0 : index
    %140 = vector.load %arg8[%c0_115, %c0_116] : memref<128x128xbf16, #tpu.memory_space<vmem>>, vector<128x128xbf16>
    %cst_117 = arith.constant dense<0.000000e+00> : vector<8x128xf32>
    %141 = tpu.matmul %139, %140, %cst_117 {dimension_numbers = #tpu.dot_dimension_numbers<[1], [0], [0], [1], [0, 0, 1, 1], [], []>} : vector<8x128xbf16>, vector<128x128xbf16>, vector<8x128xf32> -> vector<8x128xf32>
    %c0_118 = arith.constant 0 : index
    %c0_119 = arith.constant 0 : index
    %142 = vector.load %arg9[%c0_118, %c0_119] : memref<1x128xf32, #tpu.memory_space<vmem>>, vector<1x128xf32>
    %143 = vector.broadcast %142 : vector<1x128xf32> to vector<8x128xf32>
    %144 = arith.addf %141, %143 : vector<8x128xf32>
    %c0_120 = arith.constant 0 : index
    %c0_121 = arith.constant 0 : index
    %145 = vector.load %arg10[%c0_120, %c0_121] : memref<8x128xf32, #tpu.memory_space<vmem>>, vector<8x128xf32>
    tpu.vector_store %arg10[%c0_120, %c0_121], %144 {strides = array<i32>} : memref<8x128xf32, #tpu.memory_space<vmem>>, vector<8x128xf32>,
    return
  }
  func.func @transform_0(%arg0: i32) -> (i32, i32) {
    %c0_i32 = arith.constant 0 : i32
    %c0_i32_0 = arith.constant 0 : i32
    return %arg0, %c0_i32 : i32, i32
  }
  func.func @transform_1(%arg0: i32) -> (i32, i32) {
    %c0_i32 = arith.constant 0 : i32
    %c0_i32_0 = arith.constant 0 : i32
    %c0_i32_1 = arith.constant 0 : i32
    return %c0_i32, %c0_i32_0 : i32, i32
  }
  func.func @transform_2(%arg0: i32) -> (i32, i32) {
    %c0_i32 = arith.constant 0 : i32
    %c0_i32_0 = arith.constant 0 : i32
    %c0_i32_1 = arith.constant 0 : i32
    return %c0_i32, %c0_i32_0 : i32, i32
  }
  func.func @transform_3(%arg0: i32) -> (i32, i32, i32) {
    %c0_i32 = arith.constant 0 : i32
    %c0_i32_0 = arith.constant 0 : i32
    %c0_i32_1 = arith.constant 0 : i32
    %c0_i32_2 = arith.constant 0 : i32
    return %c0_i32, %c0_i32_0, %c0_i32_1 : i32, i32, i32
  }
  func.func @transform_4(%arg0: i32) -> (i32, i32) {
    %c0_i32 = arith.constant 0 : i32
    %c0_i32_0 = arith.constant 0 : i32
    %c0_i32_1 = arith.constant 0 : i32
    return %c0_i32, %c0_i32_0 : i32, i32
  }
  func.func @transform_5(%arg0: i32) -> (i32, i32, i32) {
    %c0_i32 = arith.constant 0 : i32
    %c0_i32_0 = arith.constant 0 : i32
    %c0_i32_1 = arith.constant 0 : i32
    %c0_i32_2 = arith.constant 0 : i32
    return %c0_i32, %c0_i32_0, %c0_i32_1 : i32, i32, i32
  }
  func.func @transform_6(%arg0: i32) -> (i32, i32) {
    %c0_i32 = arith.constant 0 : i32
    %c0_i32_0 = arith.constant 0 : i32
    %c0_i32_1 = arith.constant 0 : i32
    return %c0_i32, %c0_i32_0 : i32, i32
  }
  func.func @transform_7(%arg0: i32) -> (i32, i32) {
    %c0_i32 = arith.constant 0 : i32
    %c0_i32_0 = arith.constant 0 : i32
    %c0_i32_1 = arith.constant 0 : i32
    return %c0_i32, %c0_i32_0 : i32, i32
  }
  func.func @transform_8(%arg0: i32) -> (i32, i32) {
    %c0_i32 = arith.constant 0 : i32
    %c0_i32_0 = arith.constant 0 : i32
    %c0_i32_1 = arith.constant 0 : i32
    return %c0_i32, %c0_i32_0 : i32, i32
  }
  func.func @transform_9(%arg0: i32) -> (i32, i32) {
    %c0_i32 = arith.constant 0 : i32
    %c0_i32_0 = arith.constant 0 : i32
    return %arg0, %c0_i32 : i32, i32
  }
}

</mosaic_0001>

<bundles_post_ra>
// kernel: tcrnet_forward.1
= control target key start
LH: loop header
LB: loop body
LE: loop exit
PB: predicated region body
PF: predicated region fallthrough
CT: control target
= control target key end

     0   :  { %s4996_s30 = smov 0   ;;  %s5820_s0 = inlined_call_operand.vmem [shape: bf16[96,896], index: 0, kind: input, shape index: {}]   ;;  %s5821_s1 = inlined_call_operand.vmem [shape: bf16[896,128], index: 1, kind: input, shape index: {}]   ;;  %s5822_s2 = inlined_call_operand.vmem [shape: f32[1,128], index: 2, kind: input, shape index: {}]   ;;  %s5823_s3 = inlined_call_operand.vmem [shape: bf16[9,128,128], index: 3, kind: input, shape index: {}]   ;;  %s5824_s4 = inlined_call_operand.vmem [shape: f32[1,128], index: 4, kind: input, shape index: {}]   ;;  %s5825_s5 = inlined_call_operand.vmem [shape: bf16[9,128,128], index: 5, kind: input, shape index: {}]   ;;  %s5826_s6 = inlined_call_operand.vmem [shape: f32[1,128], index: 6, kind: input, shape index: {}]   ;;  %s5827_s7 = inlined_call_operand.vmem [shape: bf16[128,128], index: 7, kind: input, shape index: {}]   ;;  %s5828_s8 = inlined_call_operand.vmem [shape: f32[1,128], index: 8, kind: input, shape index: {}]   ;;  %s5829_s9 = inlined_call_operand.vmem [shape: f32[16,128], index: 9, kind: output, shape index: {}]  }
   0x1 LB: > { %s5002_s10 = sadd.s32 4294967295, %s4942_s30   ;;  %p3460_p0 = scmp.ge.s32.totalorder %s4942_s30, 1  ;;  %s4942_s30 = sphi %s4996_s30, %s19_s30  }
   0x2   : > { %p289_p1 = scmp.lt.s32.totalorder %s4942_s30, 3 }
   0x4   : > { %p290_p2 = pnand %p3460_p0, %p289_p1 }
   0x5   : > { %v4698_v0 = vld [vmem:[%s5821_s1 + $0x40] sm:$0xff] (!%p290_p2)   ;;  %v4702_v4 = vld [vmem:[%s5821_s1 + $0x48] sm:$0xff] (!%p290_p2)   ;;  %v4706_v8 = vld [vmem:[%s5821_s1 + $0x50] sm:$0xff] (!%p290_p2)   ;;  %s325_s18 = smul.u32 (!%p290_p2), 6, %s5002_s10  ;;  %v4944_v38 = vmov (!%p290_p2), 0.0   ;;  %vm4945_vm0 = vmmov (!%p290_p2), 0  }
   0x6   : > { %293 = sbr.rel (%p290_p2) target bundleno = 1490 (0x5d2), region = 56  ;;  %v4699_v1 = vld [vmem:[%s5821_s1] sm:$0xff] (!%p290_p2)   ;;  %3954 = vmatprep.subr.bf16.mxu0 (!%p290_p2), %v4698_v0  ;;  %v4703_v5 = vld [vmem:[%s5821_s1 + $0x8] sm:$0xff] (!%p290_p2)   ;;  %v4707_v9 = vld [vmem:[%s5821_s1 + $0x10] sm:$0xff] (!%p290_p2)   ;;  %p332_p4 = scmp.lt.s32.totalorder (!%p290_p2), %s5002_s10, 1 }
   0x7   : > { %v4700_v2 = vld [vmem:[%s5821_s1 + $0xc0] sm:$0xff] (!%p290_p2)   ;;  %3955 = vmatpush3.bf16.msra.mxu0 (!%p290_p2), %v4699_v1  ;;  %v4704_v6 = vld [vmem:[%s5821_s1 + $0xc8] sm:$0xff] (!%p290_p2)   ;;  %v4708_v10 = vld [vmem:[%s5821_s1 + $0xd0] sm:$0xff] (!%p290_p2)   ;;  %p326_p3 = scmp.lt.s32.totalorder (!%p290_p2), %s325_s18, 11 }
   0x8   : > { %v4701_v3 = vld [vmem:[%s5821_s1 + $0x80] sm:$0xff] (!%p290_p2)   ;;  %3988 = vmatprep.subr.bf16.mxu1 (!%p290_p2), %v4700_v2  ;;  %3956 = vmatprep.subr.bf16.mxu0 (!%p290_p2), %v4702_v4  ;;  %v4705_v7 = vld [vmem:[%s5821_s1 + $0x88] sm:$0xff] (!%p290_p2)   ;;  %v4709_v11 = vld [vmem:[%s5821_s1 + $0x90] sm:$0xff] (!%p290_p2)  }
   0x9   : > { %3989 = vmatpush3.bf16.msra.mxu1 (!%p290_p2), %v4701_v3  ;;  %v4710_v12 = vld [vmem:[%s5821_s1 + $0x58] sm:$0xff] (!%p290_p2)   ;;  %v4714_v16 = vld [vmem:[%s5821_s1 + $0x60] sm:$0xff] (!%p290_p2)   ;;  %v4718_v20 = vld [vmem:[%s5821_s1 + $0x68] sm:$0xff] (!%p290_p2)  }
   0xa   : > { %3990 = vmatprep.subr.bf16.mxu1 (!%p290_p2), %v4704_v6  ;;  %v4711_v13 = vld [vmem:[%s5821_s1 + $0x18] sm:$0xff] (!%p290_p2)   ;;  %v4715_v17 = vld [vmem:[%s5821_s1 + $0x20] sm:$0xff] (!%p290_p2)   ;;  %v4719_v21 = vld [vmem:[%s5821_s1 + $0x28] sm:$0xff] (!%p290_p2)  }
   0xb   : > { %3957 = vmatpush3.bf16.msra.mxu0 (!%p290_p2), %v4703_v5  ;;  %v4712_v14 = vld [vmem:[%s5821_s1 + $0xd8] sm:$0xff] (!%p290_p2)   ;;  %v4716_v18 = vld [vmem:[%s5821_s1 + $0xe0] sm:$0xff] (!%p290_p2)   ;;  %v4720_v22 = vld [vmem:[%s5821_s1 + $0xe8] sm:$0xff] (!%p290_p2)  }
   0xc   : > { %3958 = vmatprep.subr.bf16.mxu0 (!%p290_p2), %v4706_v8  ;;  %v4713_v15 = vld [vmem:[%s5821_s1 + $0x98] sm:$0xff] (!%p290_p2)   ;;  %v4717_v19 = vld [vmem:[%s5821_s1 + $0xa0] sm:$0xff] (!%p290_p2)   ;;  %v4721_v23 = vld [vmem:[%s5821_s1 + $0xa8] sm:$0xff] (!%p290_p2)  }
   0xd   : > { %3991 = vmatpush3.bf16.msra.mxu1 %v4705_v7  ;;  %s5831_s18 = smov (!%p326_p3, %s325_s18), 11  ;;  %v4722_v24 = vld [vmem:[%s5821_s1 + $0x70] sm:$0xff]   ;;  %v4726_v28 = vld [vmem:[%s5821_s1 + $0x78] sm:$0xff]   ;;  %v4733_v34 = vld [vmem:[%s5821_s1 + $0x140] sm:$0xff]   ;;  %s5833_s10 = smov (!%p332_p4, %s5002_s10), 1 }
   0xe   : > { %3992 = vmatprep.subr.bf16.mxu1 %v4708_v10  ;;  %s4687_s25 = smul.u32 28, %s5831_s18  ;;  %v4723_v25 = vld [vmem:[%s5821_s1 + $0x30] sm:$0xff]   ;;  %v4727_v29 = vld [vmem:[%s5821_s1 + $0x38] sm:$0xff]   ;;  %v4737_v37 = vld [vmem:[%s5821_s1 + $0x100] sm:$0xff]  }
   0xf   : > { %3959 = vmatpush3.bf16.msra.mxu0 %v4707_v9  ;;  %v4724_v26 = vld [vmem:[%s5821_s1 + $0xf0] sm:$0xff]   ;;  %v4728_v30 = vld [vmem:[%s5821_s1 + $0xf8] sm:$0xff]   ;;  %v4738_v39 = vld [vmem:[%s5821_s1 + $0x180] sm:$0xff]  }
  0x10   : > { %3960 = vmatprep.subr.bf16.mxu0 %v4710_v12  ;;  %v4725_v27 = vld [vmem:[%s5821_s1 + $0xb0] sm:$0xff]   ;;  %s5097_s16 = scalar_lea.vmem %s5820_s0, %s4687_s25  ;;  %v4732_v33 = vld [vmem:[%s5821_s1 + $0xb8] sm:$0xff]   ;;  %v4739_v40 = vld [vmem:[%s5821_s1 + $0x148] sm:$0xff]  }
  0x11   : > { %3993 = vmatpush3.bf16.msra.mxu1 %v4709_v11  ;;  %v4729_v31 = vld [vmem:[%s5097_s16] ss:$28 sps:$4 sm:$0xff]   ;;  %v4734_v35 = vld [vmem:[%s5097_s16 + $0x8] ss:$28 sps:$4 sm:$0xff]   ;;  %v4742_v43 = vld [vmem:[%s5821_s1 + $0x150] sm:$0xff]  }
  0x12   : > { %3994 = vmatprep.subr.bf16.mxu1 %v4712_v14  ;;  %v4731_v32 = vld [vmem:[%s5097_s16 + $0x4] ss:$28 sps:$4 sm:$0xff]   ;;  %v4736_v36 = vld [vmem:[%s5097_s16 + $0xc] ss:$28 sps:$4 sm:$0xff]   ;;  %v4743_v44 = vld [vmem:[%s5821_s1 + $0x110] sm:$0xff]  }
  0x13   : > { %3961 = vmatpush3.bf16.msra.mxu0 %v4711_v13  ;;  %956 = vmatprep.mubr.bf16.mxu0 %v4731_v32  ;;  %v4740_v41 = vld [vmem:[%s5821_s1 + $0x108] sm:$0xff]   ;;  %v4744_v45 = vld [vmem:[%s5821_s1 + $0x190] sm:$0xff]   ;;  %v4745_v46 = vld [vmem:[%s5097_s16 + $0x3c] ss:$28 sps:$4 sm:$0xff]  }
  0x14   : > { %3962 = vmatprep.subr.bf16.mxu0 %v4714_v16  ;;  %1013 = vmatprep.mubr.bf16.mxu1 %v4736_v36  ;;  %v4741_v42 = vld [vmem:[%s5821_s1 + $0x188] sm:$0xff]   ;;  %v4747_v47 = vld [vmem:[%s5821_s1 + $0x158] sm:$0xff]   ;;  %v4750_v50 = vld [vmem:[%s5097_s16 + $0x44] ss:$28 sps:$4 sm:$0xff]  }
  0x15   : > { %3995 = vmatpush3.bf16.msra.mxu1 %v4713_v15  ;;  %v4748_v48 = vld [vmem:[%s5097_s16 + $0x38] ss:$28 sps:$4 sm:$0xff]   ;;  %v4752_v51 = vld [vmem:[%s5097_s16 + $0x40] ss:$28 sps:$4 sm:$0xff]   ;;  %v4759_v57 = vld [vmem:[%s5821_s1 + $0x168] sm:$0xff]  }
  0x16   : > { %3996 = vmatprep.subr.bf16.mxu1 %v4716_v18  ;;  %v4749_v49 = vld [vmem:[%s5821_s1 + $0x118] sm:$0xff]   ;;  %v4754_v53 = vld [vmem:[%s5821_s1 + $0x160] sm:$0xff]   ;;  %v4757_v56 = vld [vmem:[%s5097_s16 + $0x74] ss:$28 sps:$4 sm:$0xff]  }
  0x17   : > { %3963 = vmatpush3.bf16.msra.mxu0 %v4715_v17  ;;  %v4753_v52 = vld [vmem:[%s5821_s1 + $0x198] sm:$0xff]   ;;  %v4755_v54 = vld [vmem:[%s5821_s1 + $0x120] sm:$0xff]   ;;  %v4760_v58 = vld [vmem:[%s5097_s16 + $0x70] ss:$28 sps:$4 sm:$0xff]  }
  0x18   : > { %3964 = vmatprep.subr.bf16.mxu0 %v4718_v20  ;;  %v4756_v55 = vld [vmem:[%s5821_s1 + $0x1a0] sm:$0xff]   ;;  %v4761_v59 = vld [vmem:[%s5821_s1 + $0x128] sm:$0xff]   ;;  %v4762_v60 = vld [vmem:[%s5097_s16 + $0x7c] ss:$28 sps:$4 sm:$0xff]  }
  0x19   : > { %3997 = vmatpush3.bf16.msra.mxu1 %v4717_v19  ;;  %v4764_v61 = vld [vmem:[%s5097_s16 + $0x78] ss:$28 sps:$4 sm:$0xff]   ;;  %v4765_v62 = vld [vmem:[%s5821_s1 + $0x1a8] sm:$0xff]   ;;  %v4780_v10 = vld [vmem:[%s5097_s16 + $0x84] ss:$28 sps:$4 sm:$0xff]  }
  0x1a   : > { %3998 = vmatprep.subr.bf16.mxu1 %v4720_v22  ;;  %v4766_v63 = vld [vmem:[%s5821_s1 + $0x170] sm:$0xff]   ;;  %v4769_v2 = vld [vmem:[%s5821_s1 + $0x178] sm:$0xff]   ;;  %v4776_v8 = vld [vmem:[%s5097_s16 + $0x4c] ss:$28 sps:$4 sm:$0xff]  }
  0x1b   : > { %3965 = vmatpush3.bf16.msra.mxu0 %v4719_v21  ;;  %v4767_v0 = vld [vmem:[%s5821_s1 + $0x130] sm:$0xff]   ;;  %v4770_v3 = vld [vmem:[%s5821_s1 + $0x138] sm:$0xff]   ;;  %v4778_v9 = vld [vmem:[%s5097_s16 + $0x48] ss:$28 sps:$4 sm:$0xff]  }
  0x1c   : > { %3966 = vmatprep.subr.bf16.mxu0 %v4722_v24  ;;  %v4768_v1 = vld [vmem:[%s5821_s1 + $0x1b0] sm:$0xff]   ;;  %v4774_v6 = vld [vmem:[%s5821_s1 + $0x1b8] sm:$0xff]   ;;  %v4783_v13 = vld [vmem:[%s5097_s16 + $0x88] ss:$28 sps:$4 sm:$0xff]  }
  0x1d   : > { %3999 = vmatpush3.bf16.msra.mxu1 %v4721_v23  ;;  %v4771_v4 = vld [vmem:[%s5097_s16 + $0x10] ss:$28 sps:$4 sm:$0xff]   ;;  %v4775_v7 = vld [vmem:[%s5097_s16 + $0x18] ss:$28 sps:$4 sm:$0xff]   ;;  %v4782_v12 = vld [vmem:[%s5097_s16 + $0x80] ss:$28 sps:$4 sm:$0xff]  }
  0x1e   : > { %4000 = vmatprep.subr.bf16.mxu1 %v4724_v26  ;;  %v4773_v5 = vld [vmem:[%s5097_s16 + $0x14] ss:$28 sps:$4 sm:$0xff]   ;;  %v4784_v14 = vld [vmem:[%s5823_s3 + $0x40] sm:$0xff]   ;;  %v4785_v15 = vld [vmem:[%s5823_s3 + $0x48] sm:$0xff]  }
  0x1f   : > { %3967 = vmatpush3.bf16.msra.mxu0 %v4723_v25  ;;  %v4779_v11 = vld [vmem:[%s5097_s16 + $0x50] ss:$28 sps:$4 sm:$0xff]   ;;  %v4787_v17 = vld [vmem:[%s5823_s3 + $0x58] sm:$0xff]   ;;  %v4788_v18 = vld [vmem:[%s5823_s3 + $0x60] sm:$0xff]   ;;  %s3462_s16 = sshll.u32 %s5833_s10, 3 }
  0x20   : > { %3968 = vmatprep.subr.bf16.mxu0 %v4726_v28  ;;  %v4786_v16 = vld [vmem:[%s5823_s3 + $0x50] sm:$0xff]   ;;  %v4789_v19 = vld [vmem:[%s5823_s3 + $0x68] sm:$0xff]   ;;  %v4791_v21 = vld [vmem:[%s5823_s3 + $0x78] sm:$0xff]   ;;  %s335_s28 = scalar_lea.vmem %s5829_s9, %s3462_s16 }
  0x21   : > { %4001 = vmatpush3.bf16.msra.mxu1 %v4725_v27  ;;  %v4790_v20 = vld [vmem:[%s5823_s3 + $0x70] sm:$0xff]   ;;  %v5245_v22 = vld [vmem:[%s5823_s3] sm:$0xff]  }
  0x22   : > { %4002 = vmatprep.subr.bf16.mxu1 %v4728_v30  ;;  %v3463_v24 = vld [vmem:[%s5822_s2] ss:$0 sm:$0xff] }
  0x23   : > { %3969 = vmatpush3.bf16.msra.mxu0 %v4727_v29 }
  0x24   : > { %4022 = vmatprep.subr.bf16.mxu0 %v4733_v34 }
  0x25   : > { %4003 = vmatpush3.bf16.msra.mxu1 %v4732_v33 }
  0x26   : > { %957 = vmatmul.mubr.bf16.vlgmr.msra.gmra.mrb[0].mxu0 %v4729_v31  ;;  %4247 = vmatprep.subr.bf16.mxu1 %v4944_v38 }
  0x27   : > { %4023 = vmatpush3.bf16.msra.mxu0 %v4737_v37  ;;  %964 = vmatprep.mubr.bf16.mxu0 %v4745_v46 }
  0x28   : > { %1014 = vmatmul.mubr.bf16.vlgmr.msra.gmra.mrb[0].mxu1 %v4734_v35  ;;  %4024 = vmatprep.subr.bf16.mxu0 %v4739_v40 }
  0x29   : > { %4248 = vmatpush3.bf16.msra.mxu1 %v4738_v39  ;;  %1021 = vmatprep.mubr.bf16.mxu1 %v4750_v50 }
  0x2a   : > { %4249 = vmatprep.subr.bf16.mxu1 %v4944_v38 }
  0x2b   : > { %4025 = vmatpush3.bf16.msra.mxu0 %v4740_v41 }
  0x2c   : > { %4026 = vmatprep.subr.bf16.mxu0 %v4742_v43 }
  0x2d   : > { %4250 = vmatpush3.bf16.msra.mxu1 %v4741_v42 }
  0x2e   : > { %4251 = vmatprep.subr.bf16.mxu1 %v4944_v38  ;;  %965 = vmatmul.mubr.bf16.gmra.mrb[4].mxu0 %v4748_v48 }
  0x2f   : > { %4027 = vmatpush3.bf16.msra.mxu0 %v4743_v44  ;;  %972 = vmatprep.mubr.bf16.mxu0 %v4757_v56 }
  0x30   : > { %4028 = vmatprep.subr.bf16.mxu0 %v4747_v47  ;;  %1022 = vmatmul.mubr.bf16.gmra.mrb[4].mxu1 %v4752_v51 }
  0x31   : > { %4252 = vmatpush3.bf16.msra.mxu1 %v4744_v45  ;;  %1029 = vmatprep.mubr.bf16.mxu1 %v4762_v60 }
  0x32   : > { %4253 = vmatprep.subr.bf16.mxu1 %v4944_v38 }
  0x33   : > { %4029 = vmatpush3.bf16.msra.mxu0 %v4749_v49 }
  0x34   : > { %4030 = vmatprep.subr.bf16.mxu0 %v4754_v53 }
  0x35   : > { %4254 = vmatpush3.bf16.msra.mxu1 %v4753_v52 }
  0x36   : > { %4255 = vmatprep.subr.bf16.mxu1 %v4944_v38  ;;  %973 = vmatmul.mubr.bf16.gmra.mrb[8].mxu0 %v4760_v58 }
  0x37   : > { %4031 = vmatpush3.bf16.msra.mxu0 %v4755_v54  ;;  %1070 = vmatprep.mubr.bf16.mxu0 %v4773_v5 }
  0x38   : > { %4032 = vmatprep.subr.bf16.mxu0 %v4759_v57  ;;  %1030 = vmatmul.mubr.bf16.gmra.mrb[8].mxu1 %v4764_v61 }
  0x39   : > { %4256 = vmatpush3.bf16.msra.mxu1 %v4756_v55  ;;  %4263 = vmatprep.mubr.msk.bf16.mxu1 %vm4945_vm0, %v4944_v38 }
  0x3a   : > { %4257 = vmatprep.subr.bf16.mxu1 %v4944_v38 }
  0x3b   : > { %4033 = vmatpush3.bf16.msra.mxu0 %v4761_v59 }
  0x3c   : > { %4034 = vmatprep.subr.bf16.mxu0 %v4766_v63 }
  0x3d   : > { %4258 = vmatpush3.bf16.msra.mxu1 %v4765_v62 }
  0x3e   : > { %4259 = vmatprep.subr.bf16.mxu1 %v4944_v38 }
  0x3f   : > { %4035 = vmatpush3.bf16.msra.mxu0 %v4767_v0 }
  0x40   : > { %4036 = vmatprep.subr.bf16.mxu0 %v4769_v2 }
  0x41   : > { %4260 = vmatpush3.bf16.msra.mxu1 %v4768_v1 }
  0x42   : > { %4261 = vmatprep.subr.bf16.mxu1 %v4944_v38 }
  0x43   : > { %4037 = vmatpush3.bf16.msra.mxu0 %v4770_v3 }
  0x44   : > { %4275 = vmatprep.subr.bf16.mxu0 %v4784_v14 }
  0x45   : > { %4262 = vmatpush3.bf16.msra.mxu1 %v4774_v6 }
  0x46   : > { %1071 = vmatmul.mubr.bf16.vlgmr.msra.gmra.mrb[12].mxu0 %v4771_v4  ;;  %4455 = vmatprep.subr.bf16.mxu1 %v4944_v38 }
  0x47   : > { %1078 = vmatprep.mubr.bf16.mxu0 %v4776_v8  ;;  %4276 = vmatpush3.bf16.msra.mxu0 %v4784_v14 }
  0x48   : > { %4264 = vmatmul.mubr.bf16.vlgmr.msra.gmra.mrb[12].mxu1 %v4775_v7  ;;  %4277 = vmatprep.subr.bf16.mxu0 %v4785_v15 }
  0x49   : > { %4267 = vmatprep.mubr.msk.bf16.mxu1 %vm4945_vm0, %v4944_v38 }
  0x4b   : > { %4278 = vmatpush3.bf16.msra.mxu0 %v4785_v15 }
  0x4c   : > { %4279 = vmatprep.subr.bf16.mxu0 %v4786_v16 }
  0x4e   : > { %1079 = vmatmul.mubr.bf16.gmra.mrb[16].mxu0 %v4778_v9 }
  0x4f   : > { %1086 = vmatprep.mubr.bf16.mxu0 %v4780_v10  ;;  %4280 = vmatpush3.bf16.msra.mxu0 %v4786_v16 }
  0x50   : > { %4268 = vmatmul.mubr.bf16.gmra.mrb[16].mxu1 %v4779_v11  ;;  %4281 = vmatprep.subr.bf16.mxu0 %v4787_v17 }
  0x51   : > { %4271 = vmatprep.mubr.msk.bf16.mxu1 %vm4945_vm0, %v4944_v38 }
  0x53   : > { %4282 = vmatpush3.bf16.msra.mxu0 %v4787_v17 }
  0x54   : > { %4283 = vmatprep.subr.bf16.mxu0 %v4788_v18 }
  0x56   : > { %1087 = vmatmul.mubr.bf16.gmra.mrb[20].mxu0 %v4782_v12 }
  0x57   : > { %4284 = vmatpush3.bf16.msra.mxu0 %v4788_v18 }
  0x58   : > { %4272 = vmatmul.mubr.bf16.gmra.mrb[20].mxu1 %v4783_v13  ;;  %4285 = vmatprep.subr.bf16.mxu0 %v4789_v19 }
  0x59   : > { %4471 = vmatprep.mubr.msk.bf16.mxu1 %vm4945_vm0, %v4944_v38 }
  0x5b   : > { %4286 = vmatpush3.bf16.msra.mxu0 %v4789_v19 }
  0x5c   : > { %4287 = vmatprep.subr.bf16.mxu0 %v4790_v20 }
  0x5f   : > { %4288 = vmatpush3.bf16.msra.mxu0 %v4790_v20 }
  0x60   : > { %4289 = vmatprep.subr.bf16.mxu0 %v4791_v21 }
  0x63   : > { %4290 = vmatpush3.bf16.msra.mxu0 %v4791_v21 }
  0x64   : > { %4295 = vmatprep.subr.bf16.mxu0 %v5245_v22 }
  0xf9   : > { %v3970_v23 = vpop.f32.mrb[0].mxu0 }
  0xfa   : > { %v3971_v25 = vpop.f32.mrb[1].mxu0 }
  0xfb   : > { %v3972_v26 = vadd.f32 %v3971_v25, %v3970_v23  ;;  %v3973_v27 = vpop.f32.mrb[2].mxu0  ;;  %v4004_v28 = vpop.f32.mrb[0].mxu1 }
  0xfc   : > { %v3974_v29 = vpop.f32.mrb[3].mxu0  ;;  %v4005_v32 = vpop.f32.mrb[1].mxu1 }
  0xfd   : > { %v959_v30 = vadd.f32 %v3972_v26, %v3463_v24  ;;  %v3975_v31 = vadd.f32 %v3974_v29, %v3973_v27  ;;  %v4006_v33 = vadd.f32 %v4005_v32, %v4004_v28  ;;  %v4007_v34 = vpop.f32.mrb[2].mxu1 }
  0xfe   : > { %v4008_v36 = vpop.f32.mrb[3].mxu1 }
  0xff   : > { %v962_v35 = vadd.f32 %v3975_v31, %v3463_v24  ;;  %v1016_v37 = vadd.f32 %v4006_v33, %v959_v30  ;;  %v4009_v39 = vadd.f32 %v4008_v36, %v4007_v34 }
 0x101   : > { %v1019_v40 = vadd.f32 %v4009_v39, %v962_v35  ;;  %v3976_v41 = vpop.f32.mrb[4].mxu0 }
 0x102   : > { %v3977_v42 = vpop.f32.mrb[5].mxu0 }
 0x103   : > { %v3978_v43 = vadd.f32 %v3977_v42, %v3976_v41  ;;  %v3979_v44 = vpop.f32.mrb[6].mxu0  ;;  %v4010_v45 = vpop.f32.mrb[4].mxu1 }
 0x104   : > { %v3980_v46 = vpop.f32.mrb[7].mxu0  ;;  %v4011_v47 = vpop.f32.mrb[5].mxu1 }
 0x105   : > { %v967_v48 = vadd.f32 %v3978_v43, %v3463_v24  ;;  %v3981_v49 = vadd.f32 %v3980_v46, %v3979_v44  ;;  %v4012_v50 = vadd.f32 %v4011_v47, %v4010_v45  ;;  %v4013_v51 = vpop.f32.mrb[6].mxu1 }
 0x106   : > { %v4014_v52 = vpop.f32.mrb[7].mxu1 }
 0x107   : > { %v970_v53 = vadd.f32 %v3981_v49, %v3463_v24  ;;  %v1024_v54 = vadd.f32 %v4012_v50, %v967_v48  ;;  %v4015_v55 = vadd.f32 %v4014_v52, %v4013_v51 }
 0x109   : > { %v1027_v56 = vadd.f32 %v4015_v55, %v970_v53  ;;  %v3982_v57 = vpop.f32.mrb[8].mxu0 }
 0x10a   : > { %v3983_v58 = vpop.f32.mrb[9].mxu0 }
 0x10b   : > { %v3984_v59 = vadd.f32 %v3983_v58, %v3982_v57  ;;  %v3985_v60 = vpop.f32.mrb[10].mxu0  ;;  %v4016_v61 = vpop.f32.mrb[8].mxu1 }
 0x10c   : > { %v3986_v62 = vpop.f32.mrb[11].mxu0  ;;  %v4017_v1 = vpop.f32.mrb[9].mxu1 }
 0x10d   : > { %v975_v63 = vadd.f32 %v3984_v59, %v3463_v24  ;;  %v3987_v0 = vadd.f32 %v3986_v62, %v3985_v60  ;;  %v4018_v2 = vadd.f32 %v4017_v1, %v4016_v61  ;;  %v4019_v3 = vpop.f32.mrb[10].mxu1 }
 0x10e   : > { %v4020_v5 = vpop.f32.mrb[11].mxu1 }
 0x10f   : > { %v978_v4 = vadd.f32 %v3987_v0, %v3463_v24  ;;  %v1032_v6 = vadd.f32 %v4018_v2, %v975_v63  ;;  %v4021_v7 = vadd.f32 %v4020_v5, %v4019_v3 }
 0x111   : > { %v1035_v8 = vadd.f32 %v4021_v7, %v978_v4 }
 0x119   : > { %v4038_v9 = vpop.f32.mrb[12].mxu0 }
 0x11a   : > { %v4039_v10 = vpop.f32.mrb[13].mxu0 }
 0x11b   : > { %v4040_v11 = vadd.f32 %v4039_v10, %v4038_v9  ;;  %v4041_v12 = vpop.f32.mrb[14].mxu0  ;;  %v1129_v13 = vpop.f32.mrb[12].mxu1  ;;  %v4794_v10 = vld [vmem:[%s5823_s3 + $0x10] sm:$0xff]  }
 0x11c   : > { %v4042_v14 = vpop.f32.mrb[15].mxu0  ;;  %v4265_v15 = vpop.f32.mrb[13].mxu1 }
 0x11d   : > { %v1073_v16 = vadd.f32 %v4040_v11, %v1016_v37  ;;  %v4043_v17 = vadd.f32 %v4042_v14, %v4041_v12  ;;  %v1132_v18 = vpop.f32.mrb[14].mxu1  ;;  %v4795_v11 = vld [vmem:[%s5823_s3 + $0x18] sm:$0xff]   ;;  %v4796_v12 = vld [vmem:[%s5823_s3 + $0x20] sm:$0xff]  }
 0x11e   : > { %v4266_v19 = vpop.f32.mrb[15].mxu1  ;;  %v4799_v14 = vld [vmem:[%s5823_s3 + $0x38] sm:$0xff]   ;;  %v4800_v15 = vld [vmem:[%s5823_s3 + $0x80] sm:$0xff]  }
 0x11f   : > { %v1130_v20 = vadd.f32 %v1129_v13, %v1073_v16  ;;  %v1076_v21 = vadd.f32 %v4043_v17, %v1019_v40  ;;  %v4798_v13 = vld [vmem:[%s5823_s3 + $0x30] sm:$0xff]  }
 0x121   : > { %vm1152_vm1 = vcmp.ge.f32.partialorder %v1130_v20, 0.0  ;;  %v1158_v23 = vmul.f32 0.1, %v1130_v20  ;;  %v1133_v24 = vadd.f32 %v1132_v18, %v1076_v21  ;;  %v4044_v25 = vpop.f32.mrb[16].mxu0 }
 0x122   : > { %v4045_v26 = vpop.f32.mrb[17].mxu0 }
 0x123   : > { %v1164_v27 = vsel %vm1152_vm1, %v1130_v20, %v1158_v23  ;;  %vm1153_vm2 = vcmp.ge.f32.partialorder %v1133_v24, 0.0  ;;  %v1159_v28 = vmul.f32 0.1, %v1133_v24  ;;  %v4046_v29 = vadd.f32 %v4045_v26, %v4044_v25  ;;  %v4047_v30 = vpop.f32.mrb[18].mxu0  ;;  %v1137_v31 = vpop.f32.mrb[16].mxu1  ;;  %v4801_v20 = vld [vmem:[%s5823_s3 + $0x88] sm:$0xff]  }
 0x124   : > { %1170 = vst [vmem:[#allocation2] sm:$0xff] %v1164_v27  ;;  %v4048_v32 = vpop.f32.mrb[19].mxu0  ;;  %v4269_v33 = vpop.f32.mrb[17].mxu1  ;;  %v4802_v23 = vld [vmem:[%s5823_s3 + $0x90] sm:$0xff]   ;;  %v4804_v25 = vld [vmem:[%s5823_s3 + $0xa0] sm:$0xff]   ;;  %v4805_v26 = vld [vmem:[%s5823_s3 + $0xa8] sm:$0xff]  }
 0x125   : > { %v1165_v34 = vsel %vm1153_vm2, %v1133_v24, %v1159_v28  ;;  %v1081_v35 = vadd.f32 %v4046_v29, %v1024_v54  ;;  %v4049_v36 = vadd.f32 %v4048_v32, %v4047_v30  ;;  %v1140_v37 = vpop.f32.mrb[18].mxu1  ;;  %v4803_v24 = vld [vmem:[%s5823_s3 + $0x98] sm:$0xff]   ;;  %v4808_v29 = vld [vmem:[%s5823_s3 + $0xc0] sm:$0xff]   ;;  %v4809_v33 = vld [vmem:[%s5823_s3 + $0xc8] sm:$0xff]  }
 0x126   : > { %1171 = vst [vmem:[#allocation2 + $0x8] sm:$0xff] %v1165_v34  ;;  %v4270_v39 = vpop.f32.mrb[19].mxu1  ;;  %v1180_v40 = vpack.c.bf16 %v1165_v34, %v1164_v27  ;;  %v4806_v27 = vld [vmem:[%s5823_s3 + $0xb0] sm:$0xff]   ;;  %v4807_v28 = vld [vmem:[%s5823_s3 + $0xb8] sm:$0xff]  }
 0x127   : > { %v1138_v41 = vadd.f32 %v1137_v31, %v1081_v35  ;;  %v1084_v42 = vadd.f32 %v4049_v36, %v1027_v56  ;;  %v4810_v34 = vld [vmem:[%s5823_s3 + $0xd0] sm:$0xff]   ;;  %v4811_v35 = vld [vmem:[%s5823_s3 + $0xd8] sm:$0xff]   ;;  %v4812_v36 = vld [vmem:[%s5823_s3 + $0xe0] sm:$0xff]  }
 0x128   : > { %v4814_v39 = vld [vmem:[%s5823_s3 + $0xf0] sm:$0xff]  }
 0x129   : > { %vm1154_vm3 = vcmp.ge.f32.partialorder %v1138_v41, 0.0  ;;  %v1160_v43 = vmul.f32 0.1, %v1138_v41  ;;  %v1141_v44 = vadd.f32 %v1140_v37, %v1084_v42  ;;  %v4050_v45 = vpop.f32.mrb[20].mxu0  ;;  %v4813_v37 = vld [vmem:[%s5823_s3 + $0xe8] sm:$0xff]  }
 0x12a   : > { %v4051_v46 = vpop.f32.mrb[21].mxu0 }
 0x12b   : > { %v5251_v47 = vsel %vm1154_vm3, %v1138_v41, %v1160_v43  ;;  %vm1155_vm4 = vcmp.ge.f32.partialorder %v1141_v44, 0.0  ;;  %v1161_v48 = vmul.f32 0.1, %v1141_v44  ;;  %v4052_v49 = vadd.f32 %v4051_v46, %v4050_v45  ;;  %v4053_v50 = vpop.f32.mrb[22].mxu0  ;;  %v1145_v51 = vpop.f32.mrb[20].mxu1  ;;  %v4816_v41 = vld [vmem:[%s5823_s3 + $0x100] sm:$0xff]  }
 0x12c   : > { %1172 = vst [vmem:[#allocation2 + $0x10] sm:$0xff] %v5251_v47  ;;  %v4054_v52 = vpop.f32.mrb[23].mxu0  ;;  %v4273_v53 = vpop.f32.mrb[21].mxu1  ;;  %v4817_v45 = vld [vmem:[%s5823_s3 + $0x108] sm:$0xff]  }
 0x12d   : > { %v1167_v54 = vsel %vm1155_vm4, %v1141_v44, %v1161_v48  ;;  %v4055_v55 = vadd.f32 %v4054_v52, %v4053_v50  ;;  %v1089_v57 = vadd.f32 %v4052_v49, %v1032_v6  ;;  %v1148_v56 = vpop.f32.mrb[22].mxu1  ;;  %v1198_v1 = vld [vmem:[#allocation2 + $0x1] sm:$0xff]  ;;  %v4819_v48 = vld [vmem:[%s5823_s3 + $0x118] sm:$0xff]  }
 0x12e   : > { %1173 = vst [vmem:[#allocation2 + $0x18] sm:$0xff] %v1167_v54  ;;  %v4274_v58 = vpop.f32.mrb[23].mxu1  ;;  %v1415_v19 = vld [vmem:[#allocation2 + $0x2] sm:$0xff]  ;;  %v4823_v52 = vld [vmem:[%s5823_s3 + $0x138] sm:$0xff]  }
 0x12f   : > { %v1146_v59 = vadd.f32 %v1145_v51, %v1089_v57  ;;  %v1092_v60 = vadd.f32 %v4055_v55, %v1035_v8  ;;  %v4793_v8 = vld [vmem:[%s5823_s3 + $0x8] sm:$0xff]   ;;  %v4820_v49 = vld [vmem:[%s5823_s3 + $0x120] sm:$0xff]   ;;  %v4822_v51 = vld [vmem:[%s5823_s3 + $0x130] sm:$0xff]  }
 0x130   : > { %v4821_v50 = vld [vmem:[%s5823_s3 + $0x128] sm:$0xff]   ;;  %v4824_v53 = vld [vmem:[%s5823_s3 + $0x140] sm:$0xff]  }
 0x131   : > { %vm1156_vm5 = vcmp.ge.f32.partialorder %v1146_v59, 0.0  ;;  %v1162_v61 = vmul.f32 0.1, %v1146_v59  ;;  %v1149_v62 = vadd.f32 %v1148_v56, %v1092_v60 }
 0x133   : > { %v1168_v63 = vsel %vm1156_vm5, %v1146_v59, %v1162_v61  ;;  %vm1157_vm6 = vcmp.ge.f32.partialorder %v1149_v62, 0.0  ;;  %v1163_v0 = vmul.f32 0.1, %v1149_v62  ;;  %v5254_v2 = vld [vmem:[#allocation2 + $0x9] sm:$0xff]  ;;  %v4856_v61 = vld [vmem:[%s5825_s5 + $0x40] sm:$0xff]  }
 0x134   : > { %1174 = vst [vmem:[#allocation2 + $0x20] sm:$0xff] %v1168_v63  ;;  %v1202_v3 = vpack.c.bf16 %v5254_v2, %v1198_v1  ;;  %v5287_v17 = vld [vmem:[#allocation2 + $0xa] sm:$0xff]  ;;  %4456 = vmatpush3.bf16.msra.mxu1 %v4856_v61 }
 0x135   : > { %v1169_v4 = vsel %vm1157_vm6, %v1149_v62, %v1163_v0  ;;  %v5257_v5 = vld [vmem:[#allocation2 + $0x11] sm:$0xff]  ;;  %v1201_v6 = vld [vmem:[#allocation2 + $0x19] sm:$0xf]  ;;  %v1419_v21 = vpack.c.bf16 %v5287_v17, %v1415_v19  ;;  %v4825_v59 = vld [vmem:[%s5823_s3 + $0x148] sm:$0xff]   ;;  %4457 = vmatprep.subr.bf16.mxu1 %v4944_v38 }
 0x136   : > { %1175 = vst [vmem:[#allocation2 + $0x28] sm:$0xff] %v1169_v4  ;;  %4291 = vmatprep.mubr.bf16.mxu0 %v1202_v3  ;;  %v1203_v7 = vpack.c.bf16 %v1201_v6, %v5257_v5  ;;  %v1543_v9 = vpack.c.bf16 %v5257_v5, %v5254_v2  ;;  %v1179_v16 = vld [vmem:[#allocation2 + $0x18] sm:$0xf]  ;;  %v1787_v58 = vld [vmem:[#allocation2 + $0xb] sm:$0xff]  ;;  %v4828_v2 = vld [vmem:[%s5823_s3 + $0x160] sm:$0xff]  }
 0x137   : > { %v1181_v18 = vpack.c.bf16 %v1179_v16, %v5251_v47  ;;  %v5315_v30 = vld [vmem:[#allocation2 + $0x12] sm:$0xff]  ;;  %v1418_v31 = vld [vmem:[#allocation2 + $0x1a] sm:$0xf]  ;;  %v4857_v63 = vld [vmem:[%s5825_s5 + $0x48] sm:$0xff]  }
 0x138   : > { %4292 = vmatmul.mubr.bf16.vlgmr.msra.gmra.mrb[24].mxu0 %v1203_v7  ;;  %v1420_v32 = vpack.c.bf16 %v1418_v31, %v5315_v30  ;;  %v1667_v46 = vpack.c.bf16 %v5315_v30, %v5287_v17  ;;  %v4818_v47 = vld [vmem:[%s5823_s3 + $0x110] sm:$0xff]   ;;  %v4827_v0 = vld [vmem:[%s5823_s3 + $0x158] sm:$0xff]   ;;  %4458 = vmatpush3.bf16.msra.mxu1 %v4857_v63  ;;  %v4829_v4 = vld [vmem:[%s5823_s3 + $0x168] sm:$0xff]  }
 0x139   : > { %4296 = vmatpush3.bf16.msra.mxu0 %v5245_v22  ;;  %4311 = vmatprep.mubr.bf16.mxu0 %v1180_v40  ;;  %v4797_v22 = vld [vmem:[%s5823_s3 + $0x28] sm:$0xff]   ;;  %v4815_v40 = vld [vmem:[%s5823_s3 + $0xf8] sm:$0xff]   ;;  %v4826_v62 = vld [vmem:[%s5823_s3 + $0x150] sm:$0xff]  }
 0x13a   : > { %4297 = vmatprep.subr.bf16.mxu0 %v4793_v8  ;;  %v5368_v57 = vld [vmem:[#allocation2 + $0x13] sm:$0xff]  ;;  %4459 = vmatprep.subr.bf16.mxu1 %v4944_v38  ;;  %v4832_v7 = vld [vmem:[%s5823_s3 + $0x180] sm:$0xff]  }
 0x13b   : > { %v1541_v42 = vld [vmem:[#allocation2 + $0x19] sm:$0xff]  ;;  %v1542_v43 = vld [vmem:[#allocation2 + $0x21] sm:$0xf]  ;;  %v1791_v60 = vpack.c.bf16 %v5368_v57, %v1787_v58  ;;  %v4858_v1 = vld [vmem:[%s5825_s5 + $0x50] sm:$0xff]  }
 0x13c   : > { %v1544_v44 = vpack.c.bf16 %v1542_v43, %v1541_v42  ;;  %v1665_v54 = vld [vmem:[#allocation2 + $0x1a] sm:$0xff]  ;;  %v1666_v55 = vld [vmem:[#allocation2 + $0x22] sm:$0xf]  ;;  %4460 = vmatpush3.bf16.msra.mxu1 %v4858_v1  ;;  %v4830_v5 = vld [vmem:[%s5823_s3 + $0x170] sm:$0xff]  }
 0x13d   : > { %4298 = vmatpush3.bf16.msra.mxu0 %v4793_v8  ;;  %v1668_v56 = vpack.c.bf16 %v1666_v55, %v1665_v54  ;;  %v4859_v3 = vld [vmem:[%s5825_s5 + $0x58] sm:$0xff]   ;;  %4461 = vmatprep.subr.bf16.mxu1 %v4944_v38  ;;  %v4838_v16 = vld [vmem:[%s5823_s3 + $0x1b0] sm:$0xff]   ;;  %v1913_v19 = vld [vmem:[#allocation2 + $0x22] sm:$0xff] }
 0x13e   : > { %4299 = vmatprep.subr.bf16.mxu0 %v4794_v10  ;;  %v4831_v6 = vld [vmem:[%s5823_s3 + $0x178] sm:$0xff]   ;;  %v4848_v31 = vld [vmem:[%s5823_s3 + $0x200] sm:$0xff]   ;;  %v4853_v43 = vld [vmem:[%s5823_s3 + $0x228] sm:$0xff]  }
 0x13f   : > { %v1789_v8 = vld [vmem:[#allocation2 + $0x1b] sm:$0xff] }
 0x140   : > { %4462 = vmatpush3.bf16.msra.mxu1 %v4859_v3  ;;  %v4839_v17 = vld [vmem:[%s5823_s3 + $0x1b8] sm:$0xff]   ;;  %v4852_v42 = vld [vmem:[%s5823_s3 + $0x220] sm:$0xff]  }
 0x141   : > { %4300 = vmatpush3.bf16.msra.mxu0 %v4794_v10  ;;  %4463 = vmatprep.subr.bf16.mxu1 %v4944_v38 }
 0x142   : > { %4301 = vmatprep.subr.bf16.mxu0 %v4795_v11 }
 0x145   : > { %4302 = vmatpush3.bf16.msra.mxu0 %v4795_v11  ;;  %v4833_v11 = vld [vmem:[%s5823_s3 + $0x188] sm:$0xff]  }
 0x146   : > { %4303 = vmatprep.subr.bf16.mxu0 %v4796_v12 }
 0x149   : > { %4304 = vmatpush3.bf16.msra.mxu0 %v4796_v12  ;;  %v1915_v12 = vpack.c.bf16 %v1665_v54, %v5315_v30  ;;  %v4847_v30 = vld [vmem:[%s5823_s3 + $0x1f8] sm:$0xff]  }
 0x14a   : > { %4305 = vmatprep.subr.bf16.mxu0 %v4797_v22 }
 0x14d   : > { %4306 = vmatpush3.bf16.msra.mxu0 %v4797_v22  ;;  %v4834_v22 = vld [vmem:[%s5823_s3 + $0x190] sm:$0xff]  }
 0x14e   : > { %4307 = vmatprep.subr.bf16.mxu0 %v4798_v13 }
 0x151   : > { %4308 = vmatpush3.bf16.msra.mxu0 %v4798_v13  ;;  %v4835_v13 = vld [vmem:[%s5823_s3 + $0x198] sm:$0xff]  }
 0x152   : > { %4309 = vmatprep.subr.bf16.mxu0 %v4799_v14 }
 0x155   : > { %4310 = vmatpush3.bf16.msra.mxu0 %v4799_v14  ;;  %v4836_v14 = vld [vmem:[%s5823_s3 + $0x1a0] sm:$0xff]  }
 0x156   : > { %4315 = vmatprep.subr.bf16.mxu0 %v4800_v15 }
 0x158   : > { %4312 = vmatmul.mubr.bf16.vlgmr.msra.gmra.mrb[24].mxu0 %v1181_v18  ;;  %v4840_v18 = vld [vmem:[%s5823_s3 + $0x1c0] sm:$0xff]  }
 0x159   : > { %4316 = vmatpush3.bf16.msra.mxu0 %v4800_v15  ;;  %4331 = vmatprep.mubr.bf16.mxu0 %v1419_v21  ;;  %v4837_v15 = vld [vmem:[%s5823_s3 + $0x1a8] sm:$0xff]  }
 0x15a   : > { %4317 = vmatprep.subr.bf16.mxu0 %v4801_v20 }
 0x15d   : > { %4318 = vmatpush3.bf16.msra.mxu0 %v4801_v20  ;;  %v1914_v20 = vld [vmem:[#allocation2 + $0x2a] sm:$0xf] }
 0x15e   : > { %4319 = vmatprep.subr.bf16.mxu0 %v4802_v23  ;;  %v1916_v21 = vpack.c.bf16 %v1914_v20, %v1913_v19  ;;  %v4875_v19 = vld [vmem:[%s5825_s5 + $0x98] sm:$0xff]   ;;  %v4876_v20 = vld [vmem:[%s5825_s5 + $0xa0] sm:$0xff]  }
 0x161   : > { %4320 = vmatpush3.bf16.msra.mxu0 %v4802_v23  ;;  %v4841_v23 = vld [vmem:[%s5823_s3 + $0x1c8] sm:$0xff]  }
 0x162   : > { %4321 = vmatprep.subr.bf16.mxu0 %v4803_v24 }
 0x165   : > { %4322 = vmatpush3.bf16.msra.mxu0 %v4803_v24  ;;  %v2039_v24 = vpack.c.bf16 %v1789_v8, %v5368_v57 }
 0x166   : > { %4323 = vmatprep.subr.bf16.mxu0 %v4804_v25 }
 0x169   : > { %4324 = vmatpush3.bf16.msra.mxu0 %v4804_v25  ;;  %v4842_v25 = vld [vmem:[%s5823_s3 + $0x1d0] sm:$0xff]  }
 0x16a   : > { %4325 = vmatprep.subr.bf16.mxu0 %v4805_v26 }
 0x16d   : > { %4326 = vmatpush3.bf16.msra.mxu0 %v4805_v26  ;;  %v4843_v26 = vld [vmem:[%s5823_s3 + $0x1d8] sm:$0xff]  }
 0x16e   : > { %4327 = vmatprep.subr.bf16.mxu0 %v4806_v27 }
 0x171   : > { %4328 = vmatpush3.bf16.msra.mxu0 %v4806_v27  ;;  %v4844_v27 = vld [vmem:[%s5823_s3 + $0x1e0] sm:$0xff]  }
 0x172   : > { %4329 = vmatprep.subr.bf16.mxu0 %v4807_v28 }
 0x175   : > { %4330 = vmatpush3.bf16.msra.mxu0 %v4807_v28  ;;  %v4845_v28 = vld [vmem:[%s5823_s3 + $0x1e8] sm:$0xff]  }
 0x176   : > { %4335 = vmatprep.subr.bf16.mxu0 %v4808_v29 }
 0x178   : > { %4332 = vmatmul.mubr.bf16.vlgmr.msra.gmra.mrb[24].mxu0 %v1420_v32  ;;  %v2037_v32 = vld [vmem:[#allocation2 + $0x23] sm:$0xff] }
 0x179   : > { %4336 = vmatpush3.bf16.msra.mxu0 %v4808_v29  ;;  %4351 = vmatprep.mubr.bf16.mxu0 %v1543_v9  ;;  %v1790_v9 = vld [vmem:[#allocation2 + $0x23] sm:$0xf]  ;;  %v4846_v29 = vld [vmem:[%s5823_s3 + $0x1f0] sm:$0xff]  }
 0x17a   : > { %4337 = vmatprep.subr.bf16.mxu0 %v4809_v33  ;;  %v1792_v10 = vpack.c.bf16 %v1790_v9, %v1789_v8  ;;  %v4865_v9 = vld [vmem:[%s5825_s5 + $0x8] sm:$0xff]  }
 0x17d   : > { %4338 = vmatpush3.bf16.msra.mxu0 %v4809_v33  ;;  %v2038_v33 = vld [vmem:[#allocation2 + $0x2b] sm:$0xf] }
 0x17e   : > { %4339 = vmatprep.subr.bf16.mxu0 %v4810_v34 }
 0x181   : > { %4340 = vmatpush3.bf16.msra.mxu0 %v4810_v34  ;;  %v2160_v34 = vld [vmem:[#allocation2 + $0x1c] sm:$0xff] }
 0x182   : > { %4341 = vmatprep.subr.bf16.mxu0 %v4811_v35 }
 0x185   : > { %4342 = vmatpush3.bf16.msra.mxu0 %v4811_v35  ;;  %v2040_v35 = vpack.c.bf16 %v2038_v33, %v2037_v32  ;;  %v4885_v32 = vld [vmem:[%s5825_s5 + $0xe8] sm:$0xff]   ;;  %v4886_v33 = vld [vmem:[%s5825_s5 + $0xf0] sm:$0xff]  }
 0x186   : > { %4343 = vmatprep.subr.bf16.mxu0 %v4812_v36 }
 0x189   : > { %4344 = vmatpush3.bf16.msra.mxu0 %v4812_v36  ;;  %v2159_v36 = vld [vmem:[#allocation2 + $0x14] sm:$0xff] }
 0x18a   : > { %4345 = vmatprep.subr.bf16.mxu0 %v4813_v37 }
 0x18d   : > { %4346 = vmatpush3.bf16.msra.mxu0 %v4813_v37  ;;  %v4849_v37 = vld [vmem:[%s5823_s3 + $0x208] sm:$0xff]  }
 0x18e   : > { %4347 = vmatprep.subr.bf16.mxu0 %v4814_v39 }
 0x191   : > { %4348 = vmatpush3.bf16.msra.mxu0 %v4814_v39  ;;  %v2163_v39 = vpack.c.bf16 %v2160_v34, %v2159_v36  ;;  %v4887_v34 = vld [vmem:[%s5825_s5 + $0xf8] sm:$0xff]   ;;  %v4888_v36 = vld [vmem:[%s5825_s5 + $0x100] sm:$0xff]  }
 0x192   : > { %4349 = vmatprep.subr.bf16.mxu0 %v4815_v40 }
 0x195   : > { %4350 = vmatpush3.bf16.msra.mxu0 %v4815_v40  ;;  %v4850_v40 = vld [vmem:[%s5823_s3 + $0x210] sm:$0xff]  }
 0x196   : > { %4355 = vmatprep.subr.bf16.mxu0 %v4816_v41 }
 0x198   : > { %4352 = vmatmul.mubr.bf16.vlgmr.msra.gmra.mrb[24].mxu0 %v1544_v44  ;;  %v4854_v44 = vld [vmem:[%s5823_s3 + $0x230] sm:$0xff]  }
 0x199   : > { %4356 = vmatpush3.bf16.msra.mxu0 %v4816_v41  ;;  %4371 = vmatprep.mubr.bf16.mxu0 %v1667_v46  ;;  %v4851_v41 = vld [vmem:[%s5823_s3 + $0x218] sm:$0xff]   ;;  %v2161_v46 = vld [vmem:[#allocation2 + $0x24] sm:$0xff] }
 0x19a   : > { %4357 = vmatprep.subr.bf16.mxu0 %v4817_v45 }
 0x19d   : > { %4358 = vmatpush3.bf16.msra.mxu0 %v4817_v45  ;;  %v4855_v45 = vld [vmem:[%s5823_s3 + $0x238] sm:$0xff]  }
 0x19e   : > { %4359 = vmatprep.subr.bf16.mxu0 %v4818_v47 }
 0x1a1   : > { %4360 = vmatpush3.bf16.msra.mxu0 %v4818_v47  ;;  %v2162_v47 = vld [vmem:[#allocation2 + $0x2c] sm:$0xf] }
 0x1a2   : > { %4361 = vmatprep.subr.bf16.mxu0 %v4819_v48 }
 0x1a5   : > { %4362 = vmatpush3.bf16.msra.mxu0 %v4819_v48  ;;  %v2164_v48 = vpack.c.bf16 %v2162_v47, %v2161_v46  ;;  %v4896_v47 = vld [vmem:[%s5825_s5 + $0x140] sm:$0xff]  }
 0x1a6   : > { %4363 = vmatprep.subr.bf16.mxu0 %v4820_v49 }
 0x1a9   : > { %4364 = vmatpush3.bf16.msra.mxu0 %v4820_v49  ;;  %v4860_v49 = vld [vmem:[%s5825_s5 + $0x60] sm:$0xff]  }
 0x1aa   : > { %4365 = vmatprep.subr.bf16.mxu0 %v4821_v50  ;;  %4464 = vmatpush3.bf16.msra.mxu1 %v4860_v49  ;;  %v4897_v49 = vld [vmem:[%s5825_s5 + $0x148] sm:$0xff]  }
 0x1ab   : > { %4465 = vmatprep.subr.bf16.mxu1 %v4944_v38 }
 0x1ad   : > { %4366 = vmatpush3.bf16.msra.mxu0 %v4821_v50  ;;  %v4861_v50 = vld [vmem:[%s5825_s5 + $0x68] sm:$0xff]  }
 0x1ae   : > { %4367 = vmatprep.subr.bf16.mxu0 %v4822_v51  ;;  %4466 = vmatpush3.bf16.msra.mxu1 %v4861_v50  ;;  %v4898_v50 = vld [vmem:[%s5825_s5 + $0x150] sm:$0xff]  }
 0x1af   : > { %4467 = vmatprep.subr.bf16.mxu1 %v4944_v38 }
 0x1b1   : > { %4368 = vmatpush3.bf16.msra.mxu0 %v4822_v51  ;;  %v4862_v51 = vld [vmem:[%s5825_s5 + $0x70] sm:$0xff]  }
 0x1b2   : > { %4369 = vmatprep.subr.bf16.mxu0 %v4823_v52  ;;  %4468 = vmatpush3.bf16.msra.mxu1 %v4862_v51  ;;  %v4899_v51 = vld [vmem:[%s5825_s5 + $0x158] sm:$0xff]  }
 0x1b3   : > { %4469 = vmatprep.subr.bf16.mxu1 %v4944_v38 }
 0x1b5   : > { %4370 = vmatpush3.bf16.msra.mxu0 %v4823_v52  ;;  %v4863_v52 = vld [vmem:[%s5825_s5 + $0x78] sm:$0xff]  }
 0x1b6   : > { %4375 = vmatprep.subr.bf16.mxu0 %v4824_v53  ;;  %4470 = vmatpush3.bf16.msra.mxu1 %v4863_v52  ;;  %v4900_v52 = vld [vmem:[%s5825_s5 + $0x160] sm:$0xff]  }
 0x1b7   : > { %4475 = vmatprep.subr.bf16.mxu1 %v4944_v38 }
 0x1b8   : > { %4372 = vmatmul.mubr.bf16.vlgmr.msra.gmra.mrb[24].mxu0 %v1668_v56 }
 0x1b9   : > { %4376 = vmatpush3.bf16.msra.mxu0 %v4824_v53  ;;  %4391 = vmatprep.mubr.bf16.mxu0 %v1791_v60  ;;  %v3741_v53 = vld [vmem:[%s5824_s4] ss:$0 sm:$0xff] }
 0x1ba   : > { %4377 = vmatprep.subr.bf16.mxu0 %v4825_v59 }
 0x1bd   : > { %4378 = vmatpush3.bf16.msra.mxu0 %v4825_v59 }
 0x1be   : > { %4379 = vmatprep.subr.bf16.mxu0 %v4826_v62 }
 0x1c1   : > { %4380 = vmatpush3.bf16.msra.mxu0 %v4826_v62 }
 0x1c2   : > { %4381 = vmatprep.subr.bf16.mxu0 %v4827_v0 }
 0x1c5   : > { %4382 = vmatpush3.bf16.msra.mxu0 %v4827_v0 }
 0x1c6   : > { %4383 = vmatprep.subr.bf16.mxu0 %v4828_v2 }
 0x1c9   : > { %4384 = vmatpush3.bf16.msra.mxu0 %v4828_v2 }
 0x1ca   : > { %4385 = vmatprep.subr.bf16.mxu0 %v4829_v4 }
 0x1cd   : > { %4386 = vmatpush3.bf16.msra.mxu0 %v4829_v4 }
 0x1ce   : > { %4387 = vmatprep.subr.bf16.mxu0 %v4830_v5 }
 0x1d1   : > { %4388 = vmatpush3.bf16.msra.mxu0 %v4830_v5 }
 0x1d2   : > { %4389 = vmatprep.subr.bf16.mxu0 %v4831_v6 }
 0x1d5   : > { %4390 = vmatpush3.bf16.msra.mxu0 %v4831_v6 }
 0x1d6   : > { %4395 = vmatprep.subr.bf16.mxu0 %v4832_v7 }
 0x1d8   : > { %4392 = vmatmul.mubr.bf16.vlgmr.msra.gmra.mrb[24].mxu0 %v1792_v10  ;;  %v4866_v10 = vld [vmem:[%s5825_s5 + $0x10] sm:$0xff]  }
 0x1d9   : > { %4396 = vmatpush3.bf16.msra.mxu0 %v4832_v7  ;;  %4411 = vmatprep.mubr.bf16.mxu0 %v1915_v12  ;;  %v4864_v7 = vld [vmem:[%s5825_s5] sm:$0xff]  }
 0x1da   : > { %4397 = vmatprep.subr.bf16.mxu0 %v4833_v11  ;;  %v4868_v12 = vld [vmem:[%s5825_s5 + $0x20] sm:$0xff]  }
 0x1dd   : > { %4398 = vmatpush3.bf16.msra.mxu0 %v4833_v11  ;;  %v4867_v11 = vld [vmem:[%s5825_s5 + $0x18] sm:$0xff]  }
 0x1de   : > { %4399 = vmatprep.subr.bf16.mxu0 %v4834_v22 }
 0x1e1   : > { %4400 = vmatpush3.bf16.msra.mxu0 %v4834_v22  ;;  %v4869_v22 = vld [vmem:[%s5825_s5 + $0x28] sm:$0xff]  }
 0x1e2   : > { %4401 = vmatprep.subr.bf16.mxu0 %v4835_v13 }
 0x1e5   : > { %4402 = vmatpush3.bf16.msra.mxu0 %v4835_v13  ;;  %v4870_v13 = vld [vmem:[%s5825_s5 + $0x30] sm:$0xff]  }
 0x1e6   : > { %4403 = vmatprep.subr.bf16.mxu0 %v4836_v14 }
 0x1e9   : > { %4404 = vmatpush3.bf16.msra.mxu0 %v4836_v14  ;;  %v4871_v14 = vld [vmem:[%s5825_s5 + $0x38] sm:$0xff]  }
 0x1ea   : > { %4405 = vmatprep.subr.bf16.mxu0 %v4837_v15 }
 0x1ed   : > { %4406 = vmatpush3.bf16.msra.mxu0 %v4837_v15  ;;  %v4872_v15 = vld [vmem:[%s5825_s5 + $0x80] sm:$0xff]  }
 0x1ee   : > { %4407 = vmatprep.subr.bf16.mxu0 %v4838_v16 }
 0x1f1   : > { %4408 = vmatpush3.bf16.msra.mxu0 %v4838_v16 }
 0x1f2   : > { %4409 = vmatprep.subr.bf16.mxu0 %v4839_v17 }
 0x1f5   : > { %4410 = vmatpush3.bf16.msra.mxu0 %v4839_v17  ;;  %v4873_v17 = vld [vmem:[%s5825_s5 + $0x88] sm:$0xff]  }
 0x1f6   : > { %4415 = vmatprep.subr.bf16.mxu0 %v4840_v18 }
 0x1f8   : > { %4412 = vmatmul.mubr.bf16.vlgmr.msra.gmra.mrb[24].mxu0 %v1916_v21  ;;  %v4877_v21 = vld [vmem:[%s5825_s5 + $0xa8] sm:$0xff]  }
 0x1f9   : > { %4416 = vmatpush3.bf16.msra.mxu0 %v4840_v18  ;;  %4431 = vmatprep.mubr.bf16.mxu0 %v2039_v24  ;;  %v4874_v18 = vld [vmem:[%s5825_s5 + $0x90] sm:$0xff]   ;;  %v4879_v24 = vld [vmem:[%s5825_s5 + $0xb8] sm:$0xff]  }
 0x1fa   : > { %4417 = vmatprep.subr.bf16.mxu0 %v4841_v23 }
 0x1fd   : > { %4418 = vmatpush3.bf16.msra.mxu0 %v4841_v23  ;;  %v4878_v23 = vld [vmem:[%s5825_s5 + $0xb0] sm:$0xff]  }
 0x1fe   : > { %4419 = vmatprep.subr.bf16.mxu0 %v4842_v25 }
 0x201   : > { %4420 = vmatpush3.bf16.msra.mxu0 %v4842_v25 }
 0x202   : > { %4421 = vmatprep.subr.bf16.mxu0 %v4843_v26 }
 0x205   : > { %4422 = vmatpush3.bf16.msra.mxu0 %v4843_v26  ;;  %v4880_v26 = vld [vmem:[%s5825_s5 + $0xc0] sm:$0xff]  }
 0x206   : > { %4423 = vmatprep.subr.bf16.mxu0 %v4844_v27 }
 0x209   : > { %4424 = vmatpush3.bf16.msra.mxu0 %v4844_v27 }
 0x20a   : > { %4425 = vmatprep.subr.bf16.mxu0 %v4845_v28 }
 0x20d   : > { %4426 = vmatpush3.bf16.msra.mxu0 %v4845_v28  ;;  %v4881_v28 = vld [vmem:[%s5825_s5 + $0xc8] sm:$0xff]  }
 0x20e   : > { %4427 = vmatprep.subr.bf16.mxu0 %v4846_v29 }
 0x211   : > { %4428 = vmatpush3.bf16.msra.mxu0 %v4846_v29  ;;  %v4882_v29 = vld [vmem:[%s5825_s5 + $0xd0] sm:$0xff]  }
 0x212   : > { %4429 = vmatprep.subr.bf16.mxu0 %v4847_v30 }
 0x215   : > { %4430 = vmatpush3.bf16.msra.mxu0 %v4847_v30  ;;  %v4883_v30 = vld [vmem:[%s5825_s5 + $0xd8] sm:$0xff]  }
 0x216   : > { %4435 = vmatprep.subr.bf16.mxu0 %v4848_v31 }
 0x218   : > { %4432 = vmatmul.mubr.bf16.vlgmr.msra.gmra.mrb[24].mxu0 %v2040_v35 }
 0x219   : > { %4436 = vmatpush3.bf16.msra.mxu0 %v4848_v31  ;;  %4451 = vmatprep.mubr.bf16.mxu0 %v2163_v39  ;;  %v4884_v31 = vld [vmem:[%s5825_s5 + $0xe0] sm:$0xff]   ;;  %v4889_v39 = vld [vmem:[%s5825_s5 + $0x108] sm:$0xff]  }
 0x21a   : > { %4437 = vmatprep.subr.bf16.mxu0 %v4849_v37 }
 0x21d   : > { %4438 = vmatpush3.bf16.msra.mxu0 %v4849_v37 }
 0x21e   : > { %4439 = vmatprep.subr.bf16.mxu0 %v4850_v40 }
 0x221   : > { %4440 = vmatpush3.bf16.msra.mxu0 %v4850_v40  ;;  %v4890_v40 = vld [vmem:[%s5825_s5 + $0x110] sm:$0xff]  }
 0x222   : > { %4441 = vmatprep.subr.bf16.mxu0 %v4851_v41 }
 0x225   : > { %4442 = vmatpush3.bf16.msra.mxu0 %v4851_v41  ;;  %v4891_v41 = vld [vmem:[%s5825_s5 + $0x118] sm:$0xff]  }
 0x226   : > { %4443 = vmatprep.subr.bf16.mxu0 %v4852_v42 }
 0x229   : > { %4444 = vmatpush3.bf16.msra.mxu0 %v4852_v42  ;;  %v4892_v42 = vld [vmem:[%s5825_s5 + $0x120] sm:$0xff]  }
 0x22a   : > { %4445 = vmatprep.subr.bf16.mxu0 %v4853_v43 }
 0x22d   : > { %4446 = vmatpush3.bf16.msra.mxu0 %v4853_v43  ;;  %v4893_v43 = vld [vmem:[%s5825_s5 + $0x128] sm:$0xff]  }
 0x22e   : > { %4447 = vmatprep.subr.bf16.mxu0 %v4854_v44 }
 0x231   : > { %4448 = vmatpush3.bf16.msra.mxu0 %v4854_v44  ;;  %v4894_v44 = vld [vmem:[%s5825_s5 + $0x130] sm:$0xff]  }
 0x232   : > { %4449 = vmatprep.subr.bf16.mxu0 %v4855_v45 }
 0x235   : > { %4450 = vmatpush3.bf16.msra.mxu0 %v4855_v45  ;;  %v4895_v45 = vld [vmem:[%s5825_s5 + $0x138] sm:$0xff]  }
 0x236   : > { %4635 = vmatprep.subr.bf16.mxu0 %v4944_v38 }
 0x238   : > { %4452 = vmatmul.mubr.bf16.vlgmr.msra.gmra.mrb[24].mxu0 %v2164_v48 }
 0x239   : > { %4651 = vmatprep.mubr.msk.bf16.mxu0 %vm4945_vm0, %v4944_v38 }
 0x30b   : > { %v4453_v54 = vpop.f32.mrb[24].mxu0 }
 0x30c   : > { %v2292_v55 = vadd.f32 %v4453_v54, %v3741_v53  ;;  %v2264_v57 = vpop.f32.mrb[25].mxu0  ;;  %v4902_v54 = vld [vmem:[%s5825_s5 + $0x170] sm:$0xff]  }
 0x30d   : > { %v2290_v56 = vadd.f32 %v3741_v53, %v2264_v57  ;;  %v4454_v58 = vpop.f32.mrb[26].mxu0 }
 0x30e   : > { %vm2296_vm7 = vcmp.ge.f32.partialorder %v2292_v55, 0.0  ;;  %v2300_v59 = vmul.f32 0.1, %v2292_v55  ;;  %v2293_v60 = vadd.f32 %v4454_v58, %v3741_v53  ;;  %v2267_v61 = vpop.f32.mrb[27].mxu0 }
 0x30f   : > { %vm2294_vm8 = vcmp.ge.f32.partialorder %v2290_v56, 0.0  ;;  %v2298_v62 = vmul.f32 0.1, %v2290_v56  ;;  %v2291_v63 = vadd.f32 %v3741_v53, %v2267_v61  ;;  %v4901_v53 = vld [vmem:[%s5825_s5 + $0x168] sm:$0xff]   ;;  %v4907_v61 = vld [vmem:[%s5825_s5 + $0x198] sm:$0xff]  }
 0x310   : > { %v2304_v0 = vsel %vm2296_vm7, %v2292_v55, %v2300_v59  ;;  %vm2297_vm9 = vcmp.ge.f32.partialorder %v2293_v60, 0.0  ;;  %v2301_v1 = vmul.f32 0.1, %v2293_v60  ;;  %v4903_v55 = vld [vmem:[%s5825_s5 + $0x178] sm:$0xff]   ;;  %v4905_v59 = vld [vmem:[%s5825_s5 + $0x188] sm:$0xff]  }
 0x311   : > { %2308 = vst [vmem:[#allocation3 + $0x10] sm:$0xff] %v2304_v0  ;;  %v2302_v2 = vsel %vm2294_vm8, %v2290_v56, %v2298_v62  ;;  %vm2295_vm10 = vcmp.ge.f32.partialorder %v2291_v63, 0.0  ;;  %v2299_v3 = vmul.f32 0.1, %v2291_v63  ;;  %v4904_v56 = vld [vmem:[%s5825_s5 + $0x180] sm:$0xff]   ;;  %v4910_v0 = vld [vmem:[%s5825_s5 + $0x1b0] sm:$0xff]  }
 0x312   : > { %2306 = vst [vmem:[#allocation3] sm:$0xff] %v2302_v2  ;;  %v2305_v4 = vsel %vm2297_vm9, %v2293_v60, %v2301_v1  ;;  %v2311_v16 = vpack.c.bf16 %v2302_v2, %v2302_v2  ;;  %v4906_v60 = vld [vmem:[%s5825_s5 + $0x190] sm:$0xff]   ;;  %v4908_v62 = vld [vmem:[%s5825_s5 + $0x1a0] sm:$0xff]   ;;  %v4911_v1 = vld [vmem:[%s5825_s5 + $0x1b8] sm:$0xff]  }
 0x313   : > { %2309 = vst [vmem:[#allocation3 + $0x18] sm:$0xf] %v2305_v4  ;;  %v2303_v5 = vsel %vm2295_vm10, %v2291_v63, %v2299_v3  ;;  %v4909_v63 = vld [vmem:[%s5825_s5 + $0x1a8] sm:$0xff]   ;;  %v4912_v3 = vld [vmem:[%s5825_s5 + $0x1c0] sm:$0xff]  }
 0x314   : > { %2307 = vst [vmem:[#allocation3 + $0x8] sm:$0xff] %v2303_v5  ;;  %v4913_v5 = vld [vmem:[%s5825_s5 + $0x1c8] sm:$0xff]  }
 0x31a   : > { %v2955_v2 = vld [vmem:[#allocation3 + $0x12] sm:$0xff] }
 0x31b   : > { %v2328_v6 = vld [vmem:[#allocation3 + $0x1] sm:$0xff]  ;;  %v2631_v35 = vld [vmem:[#allocation3 + $0x9] sm:$0xff]  ;;  %v2956_v4 = vpack.c.bf16 %v2955_v2, %v2955_v2 }
 0x31c   : > { %v2329_v8 = vpack.c.bf16 %v2328_v6, %v2328_v6  ;;  %v2523_v25 = vld [vmem:[#allocation3 + $0x2] sm:$0xff]  ;;  %v2632_v37 = vpack.c.bf16 %v2631_v35, %v2631_v35  ;;  %v2739_v46 = vld [vmem:[#allocation3 + $0xa] sm:$0xff] }
 0x31d   : > { %v2524_v27 = vpack.c.bf16 %v2523_v25, %v2523_v25  ;;  %v2740_v48 = vpack.c.bf16 %v2739_v46, %v2739_v46  ;;  %v2847_v57 = vld [vmem:[#allocation3 + $0xb] sm:$0xff]  ;;  %v4914_v6 = vld [vmem:[%s5825_s5 + $0x1d0] sm:$0xff]  }
 0x31e   : > { %4472 = vmatmul.mubr.bf16.vlgmr.msra.gmra.mrb[24].mxu1 %v2329_v8  ;;  %v2848_v58 = vpack.c.bf16 %v2847_v57, %v2847_v57  ;;  %v4916_v8 = vld [vmem:[%s5825_s5 + $0x1e0] sm:$0xff]   ;;  %v4930_v46 = vld [vmem:[%s5827_s7 + $0x10] sm:$0xff]   ;;  %v4935_v57 = vld [vmem:[%s5827_s7 + $0x38] sm:$0xff]  }
 0x31f   : > { %4476 = vmatpush3.bf16.msra.mxu1 %v4864_v7  ;;  %4491 = vmatprep.mubr.msk.bf16.mxu1 %vm4945_vm0, %v4944_v38  ;;  %v4915_v7 = vld [vmem:[%s5825_s5 + $0x1d8] sm:$0xff]  }
 0x320   : > { %4477 = vmatprep.subr.bf16.mxu1 %v4944_v38 }
 0x323   : > { %4478 = vmatpush3.bf16.msra.mxu1 %v4865_v9  ;;  %v4917_v9 = vld [vmem:[%s5825_s5 + $0x1e8] sm:$0xff]  }
 0x324   : > { %4479 = vmatprep.subr.bf16.mxu1 %v4944_v38 }
 0x327   : > { %4480 = vmatpush3.bf16.msra.mxu1 %v4866_v10 }
 0x328   : > { %4481 = vmatprep.subr.bf16.mxu1 %v4944_v38 }
 0x32b   : > { %4482 = vmatpush3.bf16.msra.mxu1 %v4867_v11 }
 0x32c   : > { %4483 = vmatprep.subr.bf16.mxu1 %v4944_v38 }
 0x32f   : > { %4484 = vmatpush3.bf16.msra.mxu1 %v4868_v12 }
 0x330   : > { %4485 = vmatprep.subr.bf16.mxu1 %v4944_v38 }
 0x333   : > { %4486 = vmatpush3.bf16.msra.mxu1 %v4869_v22  ;;  %v4918_v22 = vld [vmem:[%s5825_s5 + $0x1f0] sm:$0xff]  }
 0x334   : > { %4487 = vmatprep.subr.bf16.mxu1 %v4944_v38 }
 0x337   : > { %4488 = vmatpush3.bf16.msra.mxu1 %v4870_v13 }
 0x338   : > { %4489 = vmatprep.subr.bf16.mxu1 %v4944_v38 }
 0x33b   : > { %4490 = vmatpush3.bf16.msra.mxu1 %v4871_v14  ;;  %v4919_v14 = vld [vmem:[%s5825_s5 + $0x1f8] sm:$0xff]  }
 0x33c   : > { %4495 = vmatprep.subr.bf16.mxu1 %v4944_v38 }
 0x33e   : > { %4492 = vmatmul.mubr.bf16.vlgmr.msra.gmra.mrb[28].mxu1 %v2311_v16  ;;  %v4920_v16 = vld [vmem:[%s5825_s5 + $0x200] sm:$0xff]  }
 0x33f   : > { %4496 = vmatpush3.bf16.msra.mxu1 %v4872_v15  ;;  %4511 = vmatprep.mubr.msk.bf16.mxu1 %vm4945_vm0, %v4944_v38  ;;  %v3063_v15 = vld [vmem:[#allocation3 + $0x13] sm:$0xff] }
 0x340   : > { %4497 = vmatprep.subr.bf16.mxu1 %v4944_v38 }
 0x343   : > { %4498 = vmatpush3.bf16.msra.mxu1 %v4873_v17  ;;  %v3064_v17 = vpack.c.bf16 %v3063_v15, %v3063_v15 }
 0x344   : > { %4499 = vmatprep.subr.bf16.mxu1 %v4944_v38 }
 0x347   : > { %4500 = vmatpush3.bf16.msra.mxu1 %v4874_v18  ;;  %v4921_v18 = vld [vmem:[%s5825_s5 + $0x208] sm:$0xff]  }
 0x348   : > { %4501 = vmatprep.subr.bf16.mxu1 %v4944_v38 }
 0x34b   : > { %4502 = vmatpush3.bf16.msra.mxu1 %v4875_v19  ;;  %v4922_v19 = vld [vmem:[%s5825_s5 + $0x210] sm:$0xff]  }
 0x34c   : > { %4503 = vmatprep.subr.bf16.mxu1 %v4944_v38 }
 0x34f   : > { %4504 = vmatpush3.bf16.msra.mxu1 %v4876_v20  ;;  %v4923_v20 = vld [vmem:[%s5825_s5 + $0x218] sm:$0xff]  }
 0x350   : > { %4505 = vmatprep.subr.bf16.mxu1 %v4944_v38 }
 0x353   : > { %4506 = vmatpush3.bf16.msra.mxu1 %v4877_v21  ;;  %v4924_v21 = vld [vmem:[%s5825_s5 + $0x220] sm:$0xff]  }
 0x354   : > { %4507 = vmatprep.subr.bf16.mxu1 %v4944_v38 }
 0x357   : > { %4508 = vmatpush3.bf16.msra.mxu1 %v4878_v23  ;;  %v4925_v23 = vld [vmem:[%s5825_s5 + $0x228] sm:$0xff]  }
 0x358   : > { %4509 = vmatprep.subr.bf16.mxu1 %v4944_v38 }
 0x35b   : > { %4510 = vmatpush3.bf16.msra.mxu1 %v4879_v24 }
 0x35c   : > { %4515 = vmatprep.subr.bf16.mxu1 %v4944_v38 }
 0x35e   : > { %4512 = vmatmul.mubr.bf16.vlgmr.msra.gmra.mrb[32].mxu1 %v2524_v27 }
 0x35f   : > { %4516 = vmatpush3.bf16.msra.mxu1 %v4880_v26  ;;  %4531 = vmatprep.mubr.msk.bf16.mxu1 %vm4945_vm0, %v4944_v38 }
 0x360   : > { %4517 = vmatprep.subr.bf16.mxu1 %v4944_v38 }
 0x363   : > { %4518 = vmatpush3.bf16.msra.mxu1 %v4881_v28  ;;  %v4926_v28 = vld [vmem:[%s5825_s5 + $0x230] sm:$0xff]  }
 0x364   : > { %4519 = vmatprep.subr.bf16.mxu1 %v4944_v38 }
 0x367   : > { %4520 = vmatpush3.bf16.msra.mxu1 %v4882_v29 }
 0x368   : > { %4521 = vmatprep.subr.bf16.mxu1 %v4944_v38 }
 0x36b   : > { %4522 = vmatpush3.bf16.msra.mxu1 %v4883_v30  ;;  %v4927_v30 = vld [vmem:[%s5825_s5 + $0x238] sm:$0xff]  }
 0x36c   : > { %4523 = vmatprep.subr.bf16.mxu1 %v4944_v38 }
 0x36f   : > { %4524 = vmatpush3.bf16.msra.mxu1 %v4884_v31  ;;  %v3171_v31 = vld [vmem:[#allocation3 + $0x14] sm:$0xff] }
 0x370   : > { %4525 = vmatprep.subr.bf16.mxu1 %v4944_v38 }
 0x373   : > { %4526 = vmatpush3.bf16.msra.mxu1 %v4885_v32  ;;  %v3172_v32 = vpack.c.bf16 %v3171_v31, %v3171_v31 }
 0x374   : > { %4527 = vmatprep.subr.bf16.mxu1 %v4944_v38 }
 0x377   : > { %4528 = vmatpush3.bf16.msra.mxu1 %v4886_v33 }
 0x378   : > { %4529 = vmatprep.subr.bf16.mxu1 %v4944_v38 }
 0x37b   : > { %4530 = vmatpush3.bf16.msra.mxu1 %v4887_v34 }
 0x37c   : > { %4535 = vmatprep.subr.bf16.mxu1 %v4944_v38 }
 0x37e   : > { %4532 = vmatmul.mubr.bf16.vlgmr.msra.gmra.mrb[36].mxu1 %v2632_v37 }
 0x37f   : > { %4536 = vmatpush3.bf16.msra.mxu1 %v4888_v36  ;;  %4551 = vmatprep.mubr.msk.bf16.mxu1 %vm4945_vm0, %v4944_v38 }
 0x380   : > { %4537 = vmatprep.subr.bf16.mxu1 %v4944_v38 }
 0x383   : > { %4538 = vmatpush3.bf16.msra.mxu1 %v4889_v39 }
 0x384   : > { %4539 = vmatprep.subr.bf16.mxu1 %v4944_v38 }
 0x387   : > { %4540 = vmatpush3.bf16.msra.mxu1 %v4890_v40 }
 0x388   : > { %4541 = vmatprep.subr.bf16.mxu1 %v4944_v38 }
 0x38b   : > { %4542 = vmatpush3.bf16.msra.mxu1 %v4891_v41 }
 0x38c   : > { %4543 = vmatprep.subr.bf16.mxu1 %v4944_v38 }
 0x38f   : > { %4544 = vmatpush3.bf16.msra.mxu1 %v4892_v42 }
 0x390   : > { %4545 = vmatprep.subr.bf16.mxu1 %v4944_v38 }
 0x393   : > { %4546 = vmatpush3.bf16.msra.mxu1 %v4893_v43 }
 0x394   : > { %4547 = vmatprep.subr.bf16.mxu1 %v4944_v38 }
 0x397   : > { %4548 = vmatpush3.bf16.msra.mxu1 %v4894_v44  ;;  %v4928_v44 = vld [vmem:[%s5827_s7] sm:$0xff]  }
 0x398   : > { %4549 = vmatprep.subr.bf16.mxu1 %v4944_v38  ;;  %4636 = vmatpush3.bf16.msra.mxu0 %v4928_v44 }
 0x399   : > { %4637 = vmatprep.subr.bf16.mxu0 %v4944_v38 }
 0x39b   : > { %4550 = vmatpush3.bf16.msra.mxu1 %v4895_v45  ;;  %v4929_v45 = vld [vmem:[%s5827_s7 + $0x8] sm:$0xff]  }
 0x39c   : > { %4555 = vmatprep.subr.bf16.mxu1 %v4944_v38  ;;  %4638 = vmatpush3.bf16.msra.mxu0 %v4929_v45 }
 0x39d   : > { %4639 = vmatprep.subr.bf16.mxu0 %v4944_v38 }
 0x39e   : > { %4552 = vmatmul.mubr.bf16.vlgmr.msra.gmra.mrb[40].mxu1 %v2740_v48  ;;  %v4932_v48 = vld [vmem:[%s5827_s7 + $0x20] sm:$0xff]  }
 0x39f   : > { %4556 = vmatpush3.bf16.msra.mxu1 %v4896_v47  ;;  %4571 = vmatprep.mubr.msk.bf16.mxu1 %vm4945_vm0, %v4944_v38  ;;  %v4931_v47 = vld [vmem:[%s5827_s7 + $0x18] sm:$0xff]  }
 0x3a0   : > { %4557 = vmatprep.subr.bf16.mxu1 %v4944_v38  ;;  %4640 = vmatpush3.bf16.msra.mxu0 %v4930_v46 }
 0x3a1   : > { %4641 = vmatprep.subr.bf16.mxu0 %v4944_v38 }
 0x3a3   : > { %4558 = vmatpush3.bf16.msra.mxu1 %v4897_v49  ;;  %v4933_v49 = vld [vmem:[%s5827_s7 + $0x28] sm:$0xff]  }
 0x3a4   : > { %4559 = vmatprep.subr.bf16.mxu1 %v4944_v38  ;;  %4642 = vmatpush3.bf16.msra.mxu0 %v4931_v47 }
 0x3a5   : > { %4643 = vmatprep.subr.bf16.mxu0 %v4944_v38 }
 0x3a7   : > { %4560 = vmatpush3.bf16.msra.mxu1 %v4898_v50 }
 0x3a8   : > { %4561 = vmatprep.subr.bf16.mxu1 %v4944_v38  ;;  %4644 = vmatpush3.bf16.msra.mxu0 %v4932_v48 }
 0x3a9   : > { %4645 = vmatprep.subr.bf16.mxu0 %v4944_v38 }
 0x3ab   : > { %4562 = vmatpush3.bf16.msra.mxu1 %v4899_v51 }
 0x3ac   : > { %4563 = vmatprep.subr.bf16.mxu1 %v4944_v38  ;;  %4646 = vmatpush3.bf16.msra.mxu0 %v4933_v49 }
 0x3ad   : > { %4647 = vmatprep.subr.bf16.mxu0 %v4944_v38 }
 0x3af   : > { %4564 = vmatpush3.bf16.msra.mxu1 %v4900_v52 }
 0x3b0   : > { %4565 = vmatprep.subr.bf16.mxu1 %v4944_v38 }
 0x3b3   : > { %4566 = vmatpush3.bf16.msra.mxu1 %v4901_v53 }
 0x3b4   : > { %4567 = vmatprep.subr.bf16.mxu1 %v4944_v38 }
 0x3b7   : > { %4568 = vmatpush3.bf16.msra.mxu1 %v4902_v54  ;;  %v4934_v54 = vld [vmem:[%s5827_s7 + $0x30] sm:$0xff]  }
 0x3b8   : > { %4569 = vmatprep.subr.bf16.mxu1 %v4944_v38  ;;  %4648 = vmatpush3.bf16.msra.mxu0 %v4934_v54 }
 0x3b9   : > { %4649 = vmatprep.subr.bf16.mxu0 %v4944_v38 }
 0x3bb   : > { %4570 = vmatpush3.bf16.msra.mxu1 %v4903_v55 }
 0x3bc   : > { %4575 = vmatprep.subr.bf16.mxu1 %v4944_v38  ;;  %4650 = vmatpush3.bf16.msra.mxu0 %v4935_v57 }
 0x3be   : > { %4572 = vmatmul.mubr.bf16.vlgmr.msra.gmra.mrb[44].mxu1 %v2848_v58 }
 0x3bf   : > { %4576 = vmatpush3.bf16.msra.mxu1 %v4904_v56  ;;  %4591 = vmatprep.mubr.msk.bf16.mxu1 %vm4945_vm0, %v4944_v38 }
 0x3c0   : > { %4577 = vmatprep.subr.bf16.mxu1 %v4944_v38 }
 0x3c3   : > { %4578 = vmatpush3.bf16.msra.mxu1 %v4905_v59 }
 0x3c4   : > { %4579 = vmatprep.subr.bf16.mxu1 %v4944_v38 }
 0x3c7   : > { %4580 = vmatpush3.bf16.msra.mxu1 %v4906_v60 }
 0x3c8   : > { %4581 = vmatprep.subr.bf16.mxu1 %v4944_v38 }
 0x3cb   : > { %4582 = vmatpush3.bf16.msra.mxu1 %v4907_v61 }
 0x3cc   : > { %4583 = vmatprep.subr.bf16.mxu1 %v4944_v38 }
 0x3cf   : > { %4584 = vmatpush3.bf16.msra.mxu1 %v4908_v62 }
 0x3d0   : > { %4585 = vmatprep.subr.bf16.mxu1 %v4944_v38 }
 0x3d3   : > { %4586 = vmatpush3.bf16.msra.mxu1 %v4909_v63 }
 0x3d4   : > { %4587 = vmatprep.subr.bf16.mxu1 %v4944_v38 }
 0x3d7   : > { %4588 = vmatpush3.bf16.msra.mxu1 %v4910_v0 }
 0x3d8   : > { %4589 = vmatprep.subr.bf16.mxu1 %v4944_v38 }
 0x3db   : > { %4590 = vmatpush3.bf16.msra.mxu1 %v4911_v1 }
 0x3dc   : > { %4595 = vmatprep.subr.bf16.mxu1 %v4944_v38 }
 0x3de   : > { %4592 = vmatmul.mubr.bf16.vlgmr.msra.gmra.mrb[48].mxu1 %v2956_v4 }
 0x3df   : > { %4596 = vmatpush3.bf16.msra.mxu1 %v4912_v3  ;;  %4611 = vmatprep.mubr.msk.bf16.mxu1 %vm4945_vm0, %v4944_v38 }
 0x3e0   : > { %4597 = vmatprep.subr.bf16.mxu1 %v4944_v38 }
 0x3e3   : > { %4598 = vmatpush3.bf16.msra.mxu1 %v4913_v5 }
 0x3e4   : > { %4599 = vmatprep.subr.bf16.mxu1 %v4944_v38 }
 0x3e7   : > { %4600 = vmatpush3.bf16.msra.mxu1 %v4914_v6 }
 0x3e8   : > { %4601 = vmatprep.subr.bf16.mxu1 %v4944_v38 }
 0x3eb   : > { %4602 = vmatpush3.bf16.msra.mxu1 %v4915_v7 }
 0x3ec   : > { %4603 = vmatprep.subr.bf16.mxu1 %v4944_v38 }
 0x3ef   : > { %4604 = vmatpush3.bf16.msra.mxu1 %v4916_v8  ;;  %v3942_v8 = vld [vmem:[%s5826_s6] ss:$0 sm:$0xff] }
 0x3f0   : > { %4605 = vmatprep.subr.bf16.mxu1 %v4944_v38 }
 0x3f1   : > { %v2429_v10 = vpop.f32.mrb[24].mxu1 }
 0x3f2   : > { %v4473_v11 = vpop.f32.mrb[25].mxu1 }
 0x3f3   : > { %4606 = vmatpush3.bf16.msra.mxu1 %v4917_v9  ;;  %v2432_v12 = vpop.f32.mrb[26].mxu1 }
 0x3f4   : > { %v4474_v13 = vpop.f32.mrb[27].mxu1  ;;  %4607 = vmatprep.subr.bf16.mxu1 %v4944_v38 }
 0x3f7   : > { %4608 = vmatpush3.bf16.msra.mxu1 %v4918_v22 }
 0x3f8   : > { %4609 = vmatprep.subr.bf16.mxu1 %v4944_v38 }
 0x3fb   : > { %4610 = vmatpush3.bf16.msra.mxu1 %v4919_v14 }
 0x3fc   : > { %4615 = vmatprep.subr.bf16.mxu1 %v4944_v38 }
 0x3fe   : > { %4612 = vmatmul.mubr.bf16.vlgmr.msra.gmra.mrb[52].mxu1 %v3064_v17 }
 0x3ff   : > { %4616 = vmatpush3.bf16.msra.mxu1 %v4920_v16  ;;  %4631 = vmatprep.mubr.msk.bf16.mxu1 %vm4945_vm0, %v4944_v38  ;;  %v3943_v16 = vld [vmem:[%s5828_s8] ss:$0 sm:$0xff] }
 0x400   : > { %4617 = vmatprep.subr.bf16.mxu1 %v4944_v38 }
 0x403   : > { %4618 = vmatpush3.bf16.msra.mxu1 %v4921_v18 }
 0x404   : > { %4619 = vmatprep.subr.bf16.mxu1 %v4944_v38 }
 0x407   : > { %4620 = vmatpush3.bf16.msra.mxu1 %v4922_v19 }
 0x408   : > { %4621 = vmatprep.subr.bf16.mxu1 %v4944_v38 }
 0x40b   : > { %4622 = vmatpush3.bf16.msra.mxu1 %v4923_v20 }
 0x40c   : > { %4623 = vmatprep.subr.bf16.mxu1 %v4944_v38 }
 0x40f   : > { %4624 = vmatpush3.bf16.msra.mxu1 %v4924_v21 }
 0x410   : > { %4625 = vmatprep.subr.bf16.mxu1 %v4944_v38 }
 0x411   : > { %v2517_v24 = vpop.f32.mrb[28].mxu1 }
 0x412   : > { %v2518_v25 = vadd.f32 %v2517_v24, %v2429_v10  ;;  %v4493_v26 = vpop.f32.mrb[29].mxu1 }
 0x413   : > { %v2520_v27 = vpop.f32.mrb[30].mxu1  ;;  %4626 = vmatpush3.bf16.msra.mxu1 %v4925_v23 }
 0x414   : > { %v4494_v29 = vpop.f32.mrb[31].mxu1  ;;  %4627 = vmatprep.subr.bf16.mxu1 %v4944_v38 }
 0x417   : > { %4628 = vmatpush3.bf16.msra.mxu1 %v4926_v28 }
 0x418   : > { %4629 = vmatprep.subr.bf16.mxu1 %v4944_v38 }
 0x41b   : > { %4630 = vmatpush3.bf16.msra.mxu1 %v4927_v30 }
 0x41e   : > { %4632 = vmatmul.mubr.bf16.vlgmr.msra.gmra.mrb[56].mxu1 %v3172_v32 }
 0x431   : > { %v2624_v33 = vpop.f32.mrb[32].mxu1 }
 0x432   : > { %v2630_v34 = vadd.f32 %v2624_v33, %v2518_v25  ;;  %v4513_v35 = vpop.f32.mrb[33].mxu1 }
 0x433   : > { %v2627_v36 = vpop.f32.mrb[34].mxu1 }
 0x434   : > { %v4514_v37 = vpop.f32.mrb[35].mxu1 }
 0x451   : > { %v2732_v39 = vpop.f32.mrb[36].mxu1 }
 0x452   : > { %v2738_v40 = vadd.f32 %v2732_v39, %v2630_v34  ;;  %v4533_v41 = vpop.f32.mrb[37].mxu1 }
 0x453   : > { %v2735_v42 = vpop.f32.mrb[38].mxu1 }
 0x454   : > { %v4534_v43 = vpop.f32.mrb[39].mxu1 }
 0x471   : > { %v2840_v50 = vpop.f32.mrb[40].mxu1 }
 0x472   : > { %v2846_v51 = vadd.f32 %v2840_v50, %v2738_v40  ;;  %v4553_v52 = vpop.f32.mrb[41].mxu1 }
 0x473   : > { %v2843_v53 = vpop.f32.mrb[42].mxu1 }
 0x474   : > { %v4554_v55 = vpop.f32.mrb[43].mxu1 }
 0x491   : > { %v2948_v56 = vpop.f32.mrb[44].mxu1 }
 0x492   : > { %v2954_v58 = vadd.f32 %v2948_v56, %v2846_v51  ;;  %v4573_v59 = vpop.f32.mrb[45].mxu1 }
 0x493   : > { %v2951_v60 = vpop.f32.mrb[46].mxu1 }
 0x494   : > { %v4574_v61 = vpop.f32.mrb[47].mxu1 }
 0x4b1   : > { %v3056_v62 = vpop.f32.mrb[48].mxu1 }
 0x4b2   : > { %v3062_v63 = vadd.f32 %v3056_v62, %v2954_v58  ;;  %v4593_v0 = vpop.f32.mrb[49].mxu1 }
 0x4b3   : > { %v3059_v1 = vpop.f32.mrb[50].mxu1 }
 0x4b4   : > { %v4594_v2 = vpop.f32.mrb[51].mxu1 }
 0x4d1   : > { %v3164_v3 = vpop.f32.mrb[52].mxu1 }
 0x4d2   : > { %v3170_v4 = vadd.f32 %v3164_v3, %v3062_v63  ;;  %v4613_v5 = vpop.f32.mrb[53].mxu1 }
 0x4d3   : > { %v3167_v38 = vpop.f32.mrb[54].mxu1 }
 0x4d4   : > { %v4614_v6 = vpop.f32.mrb[55].mxu1 }
 0x4f1   : > { %v3272_v7 = vpop.f32.mrb[56].mxu1 }
 0x4f2   : > { %v3278_v9 = vadd.f32 %v3272_v7, %v3170_v4  ;;  %v4633_v10 = vpop.f32.mrb[57].mxu1 }
 0x4f3   : > { %v3275_v11 = vpop.f32.mrb[58].mxu1 }
 0x4f4   : > { %v3286_v12 = vadd.f32 %v3942_v8, %v3278_v9  ;;  %v4634_v22 = vpop.f32.mrb[59].mxu1 }
 0x4f6   : > { %vm3287_vm11 = vcmp.ge.f32.partialorder %v3286_v12, 0.0  ;;  %v3288_v13 = vmul.f32 0.01, %v3286_v12 }
 0x4f8   : > { %v3289_v14 = vsel %vm3287_vm11, %v3286_v12, %v3288_v13 }
 0x4f9   : > { %v3290_v15 = vpack.c.bf16 %v3289_v14, %v3289_v14 }
 0x4fb   : > { %4652 = vmatmul.mubr.bf16.vlgmr.msra.gmra.mrb[28].mxu0 %v3290_v15 }
 0x5ce   : > { %v3396_v17 = vpop.f32.mrb[28].mxu0 }
 0x5cf   : > { %v3397_v18 = vadd.f32 %v3943_v16, %v3396_v17  ;;  %v4653_v19 = vpop.f32.mrb[29].mxu0 }
 0x5d0   : > { %v3399_v20 = vpop.f32.mrb[30].mxu0 }
 0x5d1   : > { %3402 = vst [vmem:[%s335_s28] sm:$0xff] %v3397_v18  ;;  %v4654_v21 = vpop.f32.mrb[31].mxu0 }
 0x5d2 PF: > { %s19_s30 = sadd.s32 1, %s4942_s30  }
 0x5d3   : > { %p16_p5 = scmp.ge.s32.totalorder %s19_s30, 4  }
 0x5d5   :  { %18 = sbr.rel (!%p16_p5) target bundleno = 1 (0x1), region = 102 }

// kernel: squeeze.5
= control target key start
LH: loop header
LB: loop body
LE: loop exit
PB: predicated region body
PF: predicated region fallthrough
CT: control target
= control target key end

     0   :  { %vm7_vm0 = vcmask 64512   ;;  %s39_s0 = inlined_call_operand.vmem [shape: f32[16], index: 0, kind: input, shape index: {}]   ;;  %s40_s1 = inlined_call_operand.vmem [shape: f32[2,8], index: 1, kind: output, shape index: {}]  }
   0x1   :  { %v4_v0 = vld [vmem:[%s39_s0] sm:$0x1]  ;;  %s22_s0 = smov 120  }
   0x2   :  { %5 = vst [vmem:[#allocation1] sm:$0x1] %v4_v0 }
   0x9   :  { %v9_v1 = vld [vmem:[#allocation1] sm:$0x1]  }
   0xa   :  { %v6_v2 = vld [vmem:[#allocation1] sm:$0x1]   ;;  %10 = vrot.lane.b32.xlu0 %v9_v1, %s22_s0 }
   0xb   :  { %8 = vst.msk [vmem:[#allocation0] sm:$0x1] %vm7_vm0, %v6_v2  }
  0x7c   :  { %v11_v3 = vpop.permute.xlu0 %10  }
  0x7d   :  { %14 = vst.msk [vmem:[#allocation0 + $0x1] sm:$0x1] %vm7_vm0, %v11_v3  }
  0x84   :  { %v18_v4 = vld [vmem:[#allocation0] sm:$0x3] }
  0x85   :  { %20 = vst [vmem:[%s40_s1] sm:$0x3] %v18_v4 }

</bundles_post_ra>
